<compile_context>
chip_gen: v7x
topology: tpu7x:2x2x1
jax: 0.10.0
libtpu: 0.0.40
codegen_flags: <defaults>
</compile_context>

<pallas_src>
import jax
import jax.numpy as jnp
from jax.experimental import pallas as pl
from jax.experimental.pallas import tpu as pltpu

HIDDEN = 64      # hidden_layers in the PyTorch module
NUM_LAYERS = 2   # num_layers (hard-wired in the kernel math)
TN = 512         # rows (lanes) per grid step -- sweep 128/256/512/1024


def _sigmoid(x):
    """sigmoid via tanh identity: 1 EUP push (tanh) instead of 2 (exp+recip)."""
    return 0.5 * jnp.tanh(0.5 * x) + 0.5


def _cell(x, w1b, b1b, w2, b2b, wlb, bl):
    """One zero-state 2-layer LSTM step + linear head (rows-on-lanes layout).

    x  : (1, N)    one input scalar per lane
    w1b: (3H, N)   layer-0 input weights, pre-broadcast over lanes (i/g/o gates)
    b1b: (3H, N)   layer-0 b_ih+b_hh, pre-broadcast
    w2 : (3H, H)   layer-1 input weights (i/g/o gates)
    b2b: (3H, N)   layer-1 b_ih+b_hh, pre-broadcast
    wlb: (H, N)    linear head weight, pre-broadcast
    bl : scalar or (1,1)  linear head bias
    returns (1, N)
    """
    H = HIDDEN
    # layer 0: gates = w_ih0 * x + (b_ih0 + b_hh0); h_prev = c_prev = 0
    g1 = w1b * x + b1b                                       # (3H, N) VPU, x bcast on sublanes
    c0 = _sigmoid(g1[0:H, :]) * jnp.tanh(g1[H:2 * H, :])     # i*g  (f*c_prev == 0)
    h0 = _sigmoid(g1[2 * H:3 * H, :]) * jnp.tanh(c0)         # (H, N)
    # layer 1: gates = W_ih1 @ h0 + (b_ih1 + b_hh1); h_prev = c_prev = 0
    g2 = jnp.dot(w2, h0, preferred_element_type=jnp.float32) + b2b   # (3H, N) MXU
    c1 = _sigmoid(g2[0:H, :]) * jnp.tanh(g2[H:2 * H, :])
    h1 = _sigmoid(g2[2 * H:3 * H, :]) * jnp.tanh(c1)                 # (H, N)
    # linear head: VPU multiply + XLU sublane reduce (no N=1 MXU matmul)
    return jnp.sum(h1 * wlb, axis=0, keepdims=True) + bl             # (1, N)


def _rows_kernel(x_ref, w1b_ref, b1b_ref, w2_ref, b2b_ref, wlb_ref, bl_ref, o_ref):
    o_ref[...] = _cell(x_ref[...], w1b_ref[...], b1b_ref[...], w2_ref[...],
                       b2b_ref[...], wlb_ref[...], bl_ref[0, 0])


def _future_kernel(x_ref, w1b_ref, b1b_ref, w2_ref, b2b_ref, wlb_ref, bl_ref, o_ref):
    """Fused autoregressive chain: o_ref[f, :] = (f+1)-th future prediction."""
    # Hoist all weight loads once -- the static unroll below re-uses them.
    w1b, b1b = w1b_ref[...], b1b_ref[...]
    w2, b2b = w2_ref[...], b2b_ref[...]
    wlb, bl = wlb_ref[...], bl_ref[...]
    x = x_ref[...]                                   # (1, Bp)
    for f in range(o_ref.shape[0]):                  # static unroll: future_preds is a
        x = _cell(x, w1b, b1b, w2, b2b, wlb, bl)     # small trace-time constant
        o_ref[f:f + 1, :] = x                        # store per step (no concatenate)


def _broadcast_params(params, width):
    """Pre-broadcast the (., 1) weight columns to lane width (done once, host-side)."""
    w1, b1, w2, b2, wl, bl = params
    H = HIDDEN
    w1b = jnp.broadcast_to(w1, (3 * H, width))
    b1b = jnp.broadcast_to(b1, (3 * H, width))
    b2b = jnp.broadcast_to(b2, (3 * H, width))
    wlb = jnp.broadcast_to(wl, (H, width))
    return w1b, b1b, w2, b2b, wlb, bl


def _run_rows(rows, params):
    """rows: (N,) f32 input scalars -> (N,) f32 predictions via the tiled kernel."""
    n = rows.shape[0]
    n_pad = pl.cdiv(n, TN) * TN
    xp = jnp.pad(rows, (0, n_pad - n)).reshape(1, n_pad)
    H = HIDDEN
    w1b, b1b, w2, b2b, wlb, bl = _broadcast_params(params, TN)

    const = lambda i: (0, 0)   # weights: constant block index -> stay VMEM-resident
    weight_bytes = 4 * (3 * (3 * H) * TN + H * TN + 3 * H * H + 1)
    cost = pl.CostEstimate(
        flops=2 * 3 * H * H * n_pad + 16 * H * n_pad,
        transcendentals=8 * H * n_pad,
        bytes_accessed=8 * n_pad + weight_bytes,
    )
    out = pl.pallas_call(
        _rows_kernel,
        out_shape=jax.ShapeDtypeStruct((1, n_pad), jnp.float32),
        grid=(n_pad // TN,),
        in_specs=[
            pl.BlockSpec((1, TN), lambda i: (0, i)),          # x rows (lane-dense)
            pl.BlockSpec((3 * H, TN), const),                 # w_ih0 (i,g,o), pre-broadcast
            pl.BlockSpec((3 * H, TN), const),                 # b_ih0 + b_hh0, pre-broadcast
            pl.BlockSpec((3 * H, H), const),                  # w_ih1 (i,g,o)
            pl.BlockSpec((3 * H, TN), const),                 # b_ih1 + b_hh1, pre-broadcast
            pl.BlockSpec((H, TN), const),                     # linear weight, pre-broadcast
            pl.BlockSpec(memory_space=pltpu.MemorySpace.SMEM),  # linear bias scalar
        ],
        out_specs=pl.BlockSpec((1, TN), lambda i: (0, i)),    # lane-dense output
        compiler_params=pltpu.CompilerParams(dimension_semantics=("parallel",)),
        cost_estimate=cost,
    )(xp, w1b, b1b, w2, b2b, wlb, bl)
    return out[0, :n]


def _run_future(last, params, future_preds):
    """last: (B,) last main-loop prediction -> (B, future_preds), one fused call."""
    B = last.shape[0]
    bp = pl.cdiv(B, 128) * 128                      # lane-pad the tiny batch
    xp = jnp.pad(last, (0, bp - B)).reshape(1, bp)
    w1b, b1b, w2, b2b, wlb, bl = _broadcast_params(params, bp)
    out = pl.pallas_call(                           # no grid: whole arrays in VMEM
        _future_kernel,
        out_shape=jax.ShapeDtypeStruct((future_preds, bp), jnp.float32),
    )(xp, w1b, b1b, w2, b2b, wlb, bl)
    return out[:, :B].T                             # (B, future_preds)


def init_params(key, hidden=HIDDEN):
    """Deterministic init mirroring nn.LSTM / nn.Linear uniform(-1/sqrt(H), 1/sqrt(H)),
    packed with only the i/g/o gate blocks (forget gate is dead: c_prev == 0)."""
    bound = 1.0 / float(hidden) ** 0.5
    ks = jax.random.split(key, 10)
    u = lambda k, s: jax.random.uniform(k, s, jnp.float32, -bound, bound)

    w_ih0 = u(ks[0], (4 * hidden, 1))
    _w_hh0 = u(ks[1], (4 * hidden, hidden))   # never contributes: h_prev == 0
    b_ih0 = u(ks[2], (4 * hidden,))
    b_hh0 = u(ks[3], (4 * hidden,))
    w_ih1 = u(ks[4], (4 * hidden, hidden))
    _w_hh1 = u(ks[5], (4 * hidden, hidden))   # never contributes: h_prev == 0
    b_ih1 = u(ks[6], (4 * hidden,))
    b_hh1 = u(ks[7], (4 * hidden,))
    w_lin = u(ks[8], (1, hidden))
    b_lin = u(ks[9], (1,))

    def igo(m):  # drop the forget-gate block (rows [H:2H]); PyTorch gate order i,f,g,o
        return jnp.concatenate([m[:hidden], m[2 * hidden:]], axis=0)

    b0_comb = b_ih0 + b_hh0
    b1_comb = b_ih1 + b_hh1
    return (
        igo(w_ih0),                 # (3H, 1)
        igo(b0_comb)[:, None],      # (3H, 1)
        igo(w_ih1),                 # (3H, H)
        igo(b1_comb)[:, None],      # (3H, 1)
        w_lin.T,                    # (H, 1)
        b_lin[None, :],             # (1, 1)
    )


def lstm_forward(x, params, future_preds=0):
    """x: (B, T, 1) f32 -> (B, T + future_preds, 1) f32."""
    B, T, _ = x.shape
    # All timesteps are independent (zero state) -> one batched kernel call.
    ys = _run_rows(x.reshape(B * T), params).reshape(B, T, 1)
    if future_preds == 0:
        return ys
    fut = _run_future(ys[:, -1, 0], params, future_preds)       # (B, F)
    return jnp.concatenate([ys, fut[:, :, None]], axis=1)


def _reference_rows(rows, params):
    """Pure-JAX reference of the same math (rows-on-sublanes layout). rows: (N,) -> (N,)."""
    w1, b1, w2, b2, wl, bl = params
    H = HIDDEN
    hi = jax.lax.Precision.HIGHEST
    g1 = rows[:, None] * w1.T + b1.T                             # (N, 3H)
    h0 = jax.nn.sigmoid(g1[:, 2 * H:]) * jnp.tanh(
        jax.nn.sigmoid(g1[:, :H]) * jnp.tanh(g1[:, H:2 * H]))
    g2 = jnp.dot(h0, w2.T, precision=hi) + b2.T                  # (N, 3H)
    h1 = jax.nn.sigmoid(g2[:, 2 * H:]) * jnp.tanh(
        jax.nn.sigmoid(g2[:, :H]) * jnp.tanh(g2[:, H:2 * H]))
    return (jnp.dot(h1, wl, precision=hi) + bl)[:, 0]            # (N,)


if __name__ == "__main__":
    key = jax.random.PRNGKey(0)
    kx, kp = jax.random.split(key)

    B, T = 2, 8
    x = jax.random.normal(kx, (B, T, 1), jnp.float32)
    params = init_params(kp)

    future_preds = 2
    out = lstm_forward(x, params, future_preds=future_preds)
    out = jax.block_until_ready(out)
    assert out.shape == (B, T + future_preds, 1), out.shape

    # Cross-check vs pure-JAX reference: batched-timestep path ...
    ref_main = _reference_rows(x.reshape(B * T), params).reshape(B, T, 1)
    assert jnp.allclose(out[:, :T, :], ref_main, atol=1e-5, rtol=1e-5)

    # ... and the fused autoregressive future chain.
    y = out[:, T - 1, 0]
    ref_fut = []
    for _ in range(future_preds):
        y = _reference_rows(y, params)
        ref_fut.append(y)
    ref_fut = jnp.stack(ref_fut, axis=1)[:, :, None]             # (B, F, 1)
    assert jnp.allclose(out[:, T:, :], ref_fut, atol=1e-5, rtol=1e-5)

    print("KERNEL_OK")
</pallas_src>

<mosaic_0001>
module attributes {stable_mosaic.version = 11 : i64} {
  func.func @_rows_kernel(%arg0: i32, %arg1: memref<1x512xf32, #tpu.memory_space<vmem>>, %arg2: memref<192x512xf32, #tpu.memory_space<vmem>>, %arg3: memref<192x512xf32, #tpu.memory_space<vmem>>, %arg4: memref<192x64xf32, #tpu.memory_space<vmem>>, %arg5: memref<192x512xf32, #tpu.memory_space<vmem>>, %arg6: memref<64x512xf32, #tpu.memory_space<vmem>>, %arg7: memref<1x1xf32, #tpu.memory_space<smem>>, %arg8: memref<1x512xf32, #tpu.memory_space<vmem>>) attributes {dimension_semantics = [#tpu.dimension_semantics<parallel>], iteration_bounds = array<i64: 1>, scalar_prefetch = 0 : i64, scratch_operands = 0 : i64, tpu.core_type = #tpu.core_type<tc>, window_params = [{transform_indices = @transform_0, window_bounds = array<i64: 1, 512>}, {pipeline_mode = #tpu.pipeline_mode<synchronous>, transform_indices = @transform_1, window_bounds = array<i64: 192, 512>}, {pipeline_mode = #tpu.pipeline_mode<synchronous>, transform_indices = @transform_2, window_bounds = array<i64: 192, 512>}, {pipeline_mode = #tpu.pipeline_mode<synchronous>, transform_indices = @transform_3, window_bounds = array<i64: 192, 64>}, {pipeline_mode = #tpu.pipeline_mode<synchronous>, transform_indices = @transform_4, window_bounds = array<i64: 192, 512>}, {pipeline_mode = #tpu.pipeline_mode<synchronous>, transform_indices = @transform_5, window_bounds = array<i64: 64, 512>}, {transform_indices = @transform_6, window_bounds = array<i64: 1, 1>}, {transform_indices = @transform_7, window_bounds = array<i64: 1, 512>}]} {
    %c0 = arith.constant 0 : index
    %c0_0 = arith.constant 0 : index
    %0 = vector.load %arg1[%c0, %c0_0] : memref<1x512xf32, #tpu.memory_space<vmem>>, vector<1x512xf32>
    %c0_1 = arith.constant 0 : index
    %c0_2 = arith.constant 0 : index
    %1 = vector.load %arg2[%c0_1, %c0_2] : memref<192x512xf32, #tpu.memory_space<vmem>>, vector<192x512xf32>
    %c0_3 = arith.constant 0 : index
    %c0_4 = arith.constant 0 : index
    %2 = vector.load %arg3[%c0_3, %c0_4] : memref<192x512xf32, #tpu.memory_space<vmem>>, vector<192x512xf32>
    %c0_5 = arith.constant 0 : index
    %c0_6 = arith.constant 0 : index
    %3 = vector.load %arg4[%c0_5, %c0_6] : memref<192x64xf32, #tpu.memory_space<vmem>>, vector<192x64xf32>
    %c0_7 = arith.constant 0 : index
    %c0_8 = arith.constant 0 : index
    %4 = vector.load %arg5[%c0_7, %c0_8] : memref<192x512xf32, #tpu.memory_space<vmem>>, vector<192x512xf32>
    %c0_9 = arith.constant 0 : index
    %c0_10 = arith.constant 0 : index
    %5 = vector.load %arg6[%c0_9, %c0_10] : memref<64x512xf32, #tpu.memory_space<vmem>>, vector<64x512xf32>
    %c0_11 = arith.constant 0 : index
    %c0_12 = arith.constant 0 : index
    %6 = memref.load %arg7[%c0_11, %c0_12] : memref<1x1xf32, #tpu.memory_space<smem>>
    %7 = vector.broadcast %0 : vector<1x512xf32> to vector<192x512xf32>
    %8 = arith.mulf %1, %7 : vector<192x512xf32>
    %9 = arith.addf %8, %2 : vector<192x512xf32>
    %10 = vector.extract_strided_slice %9 {offsets = [0, 0], sizes = [64, 512], strides = [1, 1]} : vector<192x512xf32> to vector<64x512xf32>
    %cst = arith.constant 5.000000e-01 : f32
    %11 = vector.broadcast %cst : f32 to vector<64x512xf32>
    %12 = arith.mulf %11, %10 : vector<64x512xf32>
    %13 = math.tanh %12 : vector<64x512xf32>
    %cst_13 = arith.constant 5.000000e-01 : f32
    %14 = vector.broadcast %cst_13 : f32 to vector<64x512xf32>
    %15 = arith.mulf %14, %13 : vector<64x512xf32>
    %cst_14 = arith.constant 5.000000e-01 : f32
    %16 = vector.broadcast %cst_14 : f32 to vector<64x512xf32>
    %17 = arith.addf %15, %16 : vector<64x512xf32>
    %18 = vector.extract_strided_slice %9 {offsets = [64, 0], sizes = [64, 512], strides = [1, 1]} : vector<192x512xf32> to vector<64x512xf32>
    %19 = math.tanh %18 : vector<64x512xf32>
    %20 = arith.mulf %17, %19 : vector<64x512xf32>
    %21 = vector.extract_strided_slice %9 {offsets = [128, 0], sizes = [64, 512], strides = [1, 1]} : vector<192x512xf32> to vector<64x512xf32>
    %cst_15 = arith.constant 5.000000e-01 : f32
    %22 = vector.broadcast %cst_15 : f32 to vector<64x512xf32>
    %23 = arith.mulf %22, %21 : vector<64x512xf32>
    %24 = math.tanh %23 : vector<64x512xf32>
    %cst_16 = arith.constant 5.000000e-01 : f32
    %25 = vector.broadcast %cst_16 : f32 to vector<64x512xf32>
    %26 = arith.mulf %25, %24 : vector<64x512xf32>
    %cst_17 = arith.constant 5.000000e-01 : f32
    %27 = vector.broadcast %cst_17 : f32 to vector<64x512xf32>
    %28 = arith.addf %26, %27 : vector<64x512xf32>
    %29 = math.tanh %20 : vector<64x512xf32>
    %30 = arith.mulf %28, %29 : vector<64x512xf32>
    %cst_18 = arith.constant dense<0.000000e+00> : vector<192x512xf32>
    %31 = tpu.matmul %3, %30, %cst_18 {dimension_numbers = #tpu.dot_dimension_numbers<[1], [0], [0], [1], [0, 0, 1, 1], [], []>} : vector<192x64xf32>, vector<64x512xf32>, vector<192x512xf32> -> vector<192x512xf32>
    %32 = arith.addf %31, %4 : vector<192x512xf32>
    %33 = vector.extract_strided_slice %32 {offsets = [0, 0], sizes = [64, 512], strides = [1, 1]} : vector<192x512xf32> to vector<64x512xf32>
    %cst_19 = arith.constant 5.000000e-01 : f32
    %34 = vector.broadcast %cst_19 : f32 to vector<64x512xf32>
    %35 = arith.mulf %34, %33 : vector<64x512xf32>
    %36 = math.tanh %35 : vector<64x512xf32>
    %cst_20 = arith.constant 5.000000e-01 : f32
    %37 = vector.broadcast %cst_20 : f32 to vector<64x512xf32>
    %38 = arith.mulf %37, %36 : vector<64x512xf32>
    %cst_21 = arith.constant 5.000000e-01 : f32
    %39 = vector.broadcast %cst_21 : f32 to vector<64x512xf32>
    %40 = arith.addf %38, %39 : vector<64x512xf32>
    %41 = vector.extract_strided_slice %32 {offsets = [64, 0], sizes = [64, 512], strides = [1, 1]} : vector<192x512xf32> to vector<64x512xf32>
    %42 = math.tanh %41 : vector<64x512xf32>
    %43 = arith.mulf %40, %42 : vector<64x512xf32>
    %44 = vector.extract_strided_slice %32 {offsets = [128, 0], sizes = [64, 512], strides = [1, 1]} : vector<192x512xf32> to vector<64x512xf32>
    %cst_22 = arith.constant 5.000000e-01 : f32
    %45 = vector.broadcast %cst_22 : f32 to vector<64x512xf32>
    %46 = arith.mulf %45, %44 : vector<64x512xf32>
    %47 = math.tanh %46 : vector<64x512xf32>
    %cst_23 = arith.constant 5.000000e-01 : f32
    %48 = vector.broadcast %cst_23 : f32 to vector<64x512xf32>
    %49 = arith.mulf %48, %47 : vector<64x512xf32>
    %cst_24 = arith.constant 5.000000e-01 : f32
    %50 = vector.broadcast %cst_24 : f32 to vector<64x512xf32>
    %51 = arith.addf %49, %50 : vector<64x512xf32>
    %52 = math.tanh %43 : vector<64x512xf32>
    %53 = arith.mulf %51, %52 : vector<64x512xf32>
    %54 = arith.mulf %53, %5 : vector<64x512xf32>
    %cst_25 = arith.constant dense<0.000000e+00> : vector<512xf32>
    %55 = vector.multi_reduction <add>, %54, %cst_25 [0] : vector<64x512xf32> to vector<512xf32>
    %56 = vector.shape_cast %55 : vector<512xf32> to vector<1x512xf32>
    %57 = vector.broadcast %6 : f32 to vector<1x512xf32>
    %58 = arith.addf %56, %57 : vector<1x512xf32>
    %c0_26 = arith.constant 0 : index
    %c0_27 = arith.constant 0 : index
    %59 = vector.load %arg8[%c0_26, %c0_27] : memref<1x512xf32, #tpu.memory_space<vmem>>, vector<1x512xf32>
    tpu.vector_store %arg8[%c0_26, %c0_27], %58 {strides = array<i32>} : memref<1x512xf32, #tpu.memory_space<vmem>>, vector<1x512xf32>,
    return
  }
  func.func @transform_0(%arg0: i32) -> (i32, i32) {
    %c0_i32 = arith.constant 0 : i32
    %c0_i32_0 = arith.constant 0 : i32
    return %c0_i32, %arg0 : i32, i32
  }
  func.func @transform_1(%arg0: i32) -> (i32, i32) {
    %c0_i32 = arith.constant 0 : i32
    %c0_i32_0 = arith.constant 0 : i32
    %c0_i32_1 = arith.constant 0 : i32
    return %c0_i32, %c0_i32_0 : i32, i32
  }
  func.func @transform_2(%arg0: i32) -> (i32, i32) {
    %c0_i32 = arith.constant 0 : i32
    %c0_i32_0 = arith.constant 0 : i32
    %c0_i32_1 = arith.constant 0 : i32
    return %c0_i32, %c0_i32_0 : i32, i32
  }
  func.func @transform_3(%arg0: i32) -> (i32, i32) {
    %c0_i32 = arith.constant 0 : i32
    %c0_i32_0 = arith.constant 0 : i32
    %c0_i32_1 = arith.constant 0 : i32
    return %c0_i32, %c0_i32_0 : i32, i32
  }
  func.func @transform_4(%arg0: i32) -> (i32, i32) {
    %c0_i32 = arith.constant 0 : i32
    %c0_i32_0 = arith.constant 0 : i32
    %c0_i32_1 = arith.constant 0 : i32
    return %c0_i32, %c0_i32_0 : i32, i32
  }
  func.func @transform_5(%arg0: i32) -> (i32, i32) {
    %c0_i32 = arith.constant 0 : i32
    %c0_i32_0 = arith.constant 0 : i32
    %c0_i32_1 = arith.constant 0 : i32
    return %c0_i32, %c0_i32_0 : i32, i32
  }
  func.func @transform_6(%arg0: i32) -> (i32, i32) {
    %c0_i32 = arith.constant 0 : i32
    %c0_i32_0 = arith.constant 0 : i32
    %c0_i32_1 = arith.constant 0 : i32
    return %c0_i32, %c0_i32_0 : i32, i32
  }
  func.func @transform_7(%arg0: i32) -> (i32, i32) {
    %c0_i32 = arith.constant 0 : i32
    %c0_i32_0 = arith.constant 0 : i32
    return %c0_i32, %arg0 : i32, i32
  }
}

</mosaic_0001>

<bundles_post_ra>
// kernel: tpu_custom_call.1
= control target key start
LH: loop header
LB: loop body
LE: loop exit
PB: predicated region body
PF: predicated region fallthrough
CT: control target
= control target key end

     0   :  { %13 = vsyncpa [#allocation4], 0  ;;  %s3725_s0 = inlined_call_operand.vmem [shape: f32[1,512], index: 0, kind: input, shape index: {}]   ;;  %s3726_s1 = inlined_call_operand.hbm [shape: f32[192,512], index: 1, kind: input, shape index: {}]   ;;  %s3727_s2 = inlined_call_operand.hbm [shape: f32[192,512], index: 2, kind: input, shape index: {}]   ;;  %s3728_s3 = inlined_call_operand.vmem [shape: f32[192,64], index: 3, kind: input, shape index: {}]   ;;  %s3729_s4 = inlined_call_operand.hbm [shape: f32[192,512], index: 4, kind: input, shape index: {}]   ;;  %s3730_s5 = inlined_call_operand.vmem [shape: f32[64,512], index: 5, kind: input, shape index: {}]   ;;  %s3731_s6 = inlined_call_operand.<no memory space> [shape: f32[1,1], index: 6, kind: input, shape index: {}]   ;;  %s3732_s7 = inlined_call_operand.hbm [shape: f32[1,512], index: 7, kind: output, shape index: {}]  }
   0x1   :  { %14 = vsyncpa [#allocation7], 0 }
   0x2   :  { %15 = vsyncpa [#allocation5], 0  ;;  %s2720_s24 = smov [#allocation6]   ;;  %s2721_s26 = smov [#allocation3]  }
   0x3   :  { %s35_s25 = sshll.u32 %s2720_s24, 4  ;;  %s23_s27 = sshll.u32 %s2721_s26, 4  ;;  %s36_s25 = int_to_ptr.vmem [resolvable:$true] %s35_s25  ;;  %s2768_s27 = int_to_ptr.vmem [resolvable:$true] %s23_s27 }
   0x4   :  { %s2626_s30 = scalar_lea.hbm %s3727_s2, 12288 }
   0x5   :  { %p2627_p0 = scmp.ne.s32.totalorder %s3727_s2, %s2626_s30  ;;  %p2630_p1 = scmp.lt.u32.totalorder %s2626_s30, %s3727_s2 }
   0x7   :  { %p2632_p2 = pnand %p2630_p1, %p2627_p0 }
   0x9   :  { %2635 = shalt.err (!%p2632_p2)
}
   0xa   :  { %s2636_s12 = scalar_lea.vmem %s36_s25, 12288  ;;  %p2641_p4 = scmp.lt.s32.totalorder %s36_s25, %s36_s25 }
   0xb   :  { %p2637_p3 = scmp.ne.s32.totalorder %s36_s25, %s2636_s12  ;;  %p2642_p5 = scmp.lt.s32.totalorder %s2636_s12, %s2636_s12 }
   0xd   :  { %p2643_p6 = por %p2642_p5, %p2641_p4 }
   0xf   :  { %p2644_p7 = pnand %p2643_p6, %p2637_p3 }
  0x11   :  { %2647 = shalt.err (!%p2644_p7)
}
  0x12   :  { %s2722_s13 = smov 512   ;;  %s2723_s14 = smov 32  }
  0x13   :  { %41 = dma.hbm_to_vmem [thread:$0]  %s3727_s2, 12288, %s36_s25, [#allocation7], %s2722_s13, %s2722_s13, %s2723_s14  }
  0x14   :  { %s2648_s19 = scalar_lea.hbm %s3726_s1, 12288 }
  0x15   :  { %p2649_p8 = scmp.ne.s32.totalorder %s3726_s1, %s2648_s19  ;;  %p2652_p9 = scmp.lt.u32.totalorder %s2648_s19, %s3726_s1 }
  0x17   :  { %p2654_p10 = pnand %p2652_p9, %p2649_p8 }
  0x19   :  { %2657 = shalt.err (!%p2654_p10)
}
  0x1a   :  { %s2658_s24 = scalar_lea.vmem %s2768_s27, 12288  ;;  %p2663_p12 = scmp.lt.s32.totalorder %s2768_s27, %s2768_s27 }
  0x1b   :  { %p2659_p11 = scmp.ne.s32.totalorder %s2768_s27, %s2658_s24  ;;  %p2664_p13 = scmp.lt.s32.totalorder %s2658_s24, %s2658_s24 }
  0x1d   :  { %p2665_p0 = por %p2664_p13, %p2663_p12 }
  0x1f   :  { %p2666_p1 = pnand %p2665_p0, %p2659_p11 }
  0x21   :  { %2669 = shalt.err (!%p2666_p1)
}
  0x22   :  { %29 = dma.hbm_to_vmem [thread:$0]  %s3726_s1, 12288, %s2768_s27, [#allocation4], %s2722_s13, %s2722_s13, %s2723_s14  }
  0x23   :  { %s2724_s26 = smov [#allocation8]   ;;  %s2670_s8 = scalar_lea.hbm %s3729_s4, 12288 }
  0x24   :  { %s49_s28 = sshll.u32 %s2724_s26, 4  ;;  %p2671_p2 = scmp.ne.s32.totalorder %s3729_s4, %s2670_s8  ;;  %s50_s28 = int_to_ptr.vmem [resolvable:$true] %s49_s28 }
  0x25   :  { %p2674_p3 = scmp.lt.u32.totalorder %s2670_s8, %s3729_s4 }
  0x27   :  { %p2676_p4 = pnand %p2674_p3, %p2671_p2 }
  0x29   :  { %2679 = shalt.err (!%p2676_p4)
}
  0x2a   :  { %s2680_s15 = scalar_lea.vmem %s50_s28, 12288  ;;  %p2685_p6 = scmp.lt.s32.totalorder %s50_s28, %s50_s28 }
  0x2b   :  { %p2681_p5 = scmp.ne.s32.totalorder %s50_s28, %s2680_s15  ;;  %p2686_p7 = scmp.lt.s32.totalorder %s2680_s15, %s2680_s15 }
  0x2d   :  { %p2687_p8 = por %p2686_p7, %p2685_p6 }
  0x2f   :  { %p2688_p9 = pnand %p2687_p8, %p2681_p5 }
  0x31   :  { %2691 = shalt.err (!%p2688_p9)
}
  0x32   :  { %55 = dma.hbm_to_vmem [thread:$0]  %s3729_s4, 12288, %s50_s28, [#allocation7], %s2722_s13, %s2722_s13, %s2723_s14  }
  0x33   :  { %2714 = dma.done.wait [#allocation4], 12288  }
  0x34   :  { %2715 = vsyncadd [#allocation4], 4294955008 }
  0x35   :  { %2716 = dma.done.wait [#allocation7], 24576  }
  0x36   :  { %2717 = vsyncadd [#allocation7], 4294942720  ;;  %v3733_v0 = vlaneseq  ;;  %v69_v4 = vld [vmem:[%s3725_s0] sm:$0xf]  ;;  %v71_v5 = vld [vmem:[#allocation3 + $0x8] sm:$0xff]  ;;  %vm1012_vm0 = vcmask 523264  }
  0x37   :  { %v75_v6 = vld [vmem:[#allocation3 + $0x28] sm:$0xff]  ;;  %v73_v27 = vld [vmem:[#allocation3 + $0x18] sm:$0xff]  ;;  %v70_v58 = vld [vmem:[#allocation3] sm:$0xff]  ;;  %s2727_s13 = smov [#allocation9]  }
  0x38   :  { %v2821_v1 = vshrl.u32 %v3733_v0, 7  ;;  %v103_v9 = vld [vmem:[#allocation3 + $0x108] sm:$0xff]  ;;  %v77_v28 = vld [vmem:[#allocation3 + $0x38] sm:$0xff]  ;;  %v74_v59 = vld [vmem:[#allocation3 + $0x20] sm:$0xff]  ;;  %s2016_s14 = sshll.u32 %s2727_s13, 4  ;;  %s2017_s14 = int_to_ptr.vmem [resolvable:$true] %s2016_s14 }
  0x39   :  { %v107_v10 = vld [vmem:[#allocation3 + $0x128] sm:$0xff]  ;;  %v105_v35 = vld [vmem:[#allocation3 + $0x118] sm:$0xff]  ;;  %v102_v63 = vld [vmem:[#allocation3 + $0x100] sm:$0xff]  ;;  %p2697_p11 = scmp.lt.s32.totalorder %s2017_s14, %s2017_s14 }
  0x3a   :  { %3735 = vst [vmem:[#allocation13_spill] sm:$0xff] %v2821_v1  ;;  %v422_v2 = vsub.s32 1, %v2821_v1  ;;  %v430_v3 = vsub.s32 3, %v2821_v1  ;;  %v418_v7 = vsub.s32 0, %v2821_v1  ;;  %v426_v8 = vsub.s32 2, %v2821_v1  ;;  %v135_v11 = vld [vmem:[#allocation3 + $0x208] sm:$0xff] }
  0x3b   :  { %v139_v13 = vld [vmem:[#allocation3 + $0x228] sm:$0xff]  ;;  %v109_v36 = vld [vmem:[#allocation3 + $0x138] sm:$0xff]  ;;  %v344_v0 = vld [vmem:[#allocation8 + $0x1d0] sm:$0xff] }
  0x3c   :  { %v2830_v12 = vrot.slane %v69_v4, %v422_v2  ;;  %v167_v14 = vld [vmem:[#allocation6 + $0x8] sm:$0xff]  ;;  %v2832_v16 = vrot.slane %v69_v4, %v430_v3  ;;  %v2840_v29 = vrot.slane %v69_v4, %v418_v7  ;;  %v2842_v30 = vrot.slane %v69_v4, %v426_v8  ;;  %v137_v39 = vld [vmem:[#allocation3 + $0x218] sm:$0xff]  ;;  %v138_v7 = vld [vmem:[#allocation3 + $0x220] sm:$0xff] }
  0x3d   :  { %v171_v15 = vld [vmem:[#allocation6 + $0x28] sm:$0xff]  ;;  %v141_v40 = vld [vmem:[#allocation3 + $0x238] sm:$0xff] }
  0x3e   :  { %v199_v17 = vld [vmem:[#allocation6 + $0x108] sm:$0xff]  ;;  %v437_v20 = vmul.f32 %v2830_v12, %v71_v5  ;;  %v441_v21 = vmul.f32 %v2830_v12, %v75_v6  ;;  %v469_v22 = vmul.f32 %v2830_v12, %v103_v9  ;;  %v473_v23 = vmul.f32 %v2830_v12, %v107_v10  ;;  %v169_v41 = vld [vmem:[#allocation6 + $0x18] sm:$0xff]  ;;  %v106_v5 = vld [vmem:[#allocation3 + $0x120] sm:$0xff] }
  0x3f   :  { %v203_v18 = vld [vmem:[#allocation6 + $0x128] sm:$0xff]  ;;  %v501_v25 = vmul.f32 %v2830_v12, %v135_v11  ;;  %v505_v26 = vmul.f32 %v2830_v12, %v139_v13  ;;  %v439_v42 = vmul.f32 %v2832_v16, %v73_v27  ;;  %v443_v43 = vmul.f32 %v2832_v16, %v77_v28  ;;  %v173_v46 = vld [vmem:[#allocation6 + $0x38] sm:$0xff]  ;;  %v134_v6 = vld [vmem:[#allocation3 + $0x200] sm:$0xff] }
  0x40   :  { %v231_v19 = vld [vmem:[#allocation6 + $0x208] sm:$0xff]  ;;  %v533_v31 = vadd.f32 %v437_v20, %v167_v14  ;;  %v537_v32 = vadd.f32 %v441_v21, %v171_v15  ;;  %v565_v33 = vadd.f32 %v469_v22, %v199_v17  ;;  %v569_v34 = vadd.f32 %v473_v23, %v203_v18  ;;  %v201_v47 = vld [vmem:[#allocation6 + $0x118] sm:$0xff]  ;;  %v166_v9 = vld [vmem:[#allocation6] sm:$0xff] }
  0x41   :  { %v235_v24 = vld [vmem:[#allocation6 + $0x228] sm:$0xff]  ;;  %v597_v37 = vadd.f32 %v501_v25, %v231_v19  ;;  %v205_v48 = vld [vmem:[#allocation6 + $0x138] sm:$0xff]  ;;  %v471_v49 = vmul.f32 %v2832_v16, %v105_v35  ;;  %v475_v54 = vmul.f32 %v2832_v16, %v109_v36  ;;  %v503_v55 = vmul.f32 %v2832_v16, %v137_v39  ;;  %v170_v10 = vld [vmem:[#allocation6 + $0x20] sm:$0xff] }
  0x42   :  { %v601_v38 = vadd.f32 %v505_v26, %v235_v24  ;;  %v629_v44 = vmul.f32 0.5, %v533_v31  ;;  %v633_v45 = vmul.f32 0.5, %v537_v32  ;;  %2114 = vtanh.f32 %v565_v33  ;;  %v233_v52 = vld [vmem:[#allocation6 + $0x218] sm:$0xff]  ;;  %v198_v11 = vld [vmem:[#allocation6 + $0x100] sm:$0xff]  ;;  %v72_v25 = vld [vmem:[#allocation3 + $0x10] sm:$0xff] }
  0x43   :  { %2116 = vtanh.f32 %v569_v34  ;;  %v821_v50 = vmul.f32 0.5, %v597_v37  ;;  %v237_v53 = vld [vmem:[#allocation6 + $0x238] sm:$0xff]  ;;  %v507_v56 = vmul.f32 %v2832_v16, %v141_v40  ;;  %v535_v57 = vadd.f32 %v439_v42, %v169_v41  ;;  %v202_v18 = vld [vmem:[#allocation6 + $0x120] sm:$0xff]  ;;  %v76_v31 = vld [vmem:[#allocation3 + $0x30] sm:$0xff] }
  0x44   :  { %v825_v51 = vmul.f32 0.5, %v601_v38  ;;  %2118 = vtanh.f32 %v629_v44  ;;  %v539_v60 = vadd.f32 %v443_v43, %v173_v46  ;;  %v567_v61 = vadd.f32 %v471_v49, %v201_v47  ;;  %v230_v19 = vld [vmem:[#allocation6 + $0x200] sm:$0xff]  ;;  %v104_v35 = vld [vmem:[#allocation3 + $0x110] sm:$0xff] }
  0x45   :  { %2120 = vtanh.f32 %v633_v45  ;;  %v571_v62 = vadd.f32 %v475_v54, %v205_v48  ;;  %v599_v2 = vadd.f32 %v503_v55, %v233_v52  ;;  %v603_v3 = vadd.f32 %v507_v56, %v237_v53  ;;  %v234_v20 = vld [vmem:[#allocation6 + $0x220] sm:$0xff]  ;;  %v108_v36 = vld [vmem:[#allocation3 + $0x130] sm:$0xff] }
  0x46   :  { %2122 = vtanh.f32 %v821_v50  ;;  %v631_v4 = vmul.f32 0.5, %v535_v57  ;;  %v635_v8 = vmul.f32 0.5, %v539_v60  ;;  %v436_v13 = vmul.f32 %v2840_v29, %v70_v58  ;;  %v136_v37 = vld [vmem:[#allocation3 + $0x210] sm:$0xff] }
  0x47   :  { %2124 = vtanh.f32 %v825_v51  ;;  %v440_v14 = vmul.f32 %v2840_v29, %v74_v59  ;;  %v823_v15 = vmul.f32 0.5, %v599_v2  ;;  %v827_v17 = vmul.f32 0.5, %v603_v3  ;;  %v140_v41 = vld [vmem:[#allocation3 + $0x230] sm:$0xff] }
  0x48   :  { %2126 = vtanh.f32 %v631_v4  ;;  %v468_v21 = vmul.f32 %v2840_v29, %v102_v63  ;;  %v472_v22 = vmul.f32 %v2840_v29, %v106_v5  ;;  %v500_v23 = vmul.f32 %v2840_v29, %v134_v6  ;;  %v168_v42 = vld [vmem:[#allocation6 + $0x10] sm:$0xff] }
  0x49   :  { %2128 = vtanh.f32 %v635_v8  ;;  %v504_v24 = vmul.f32 %v2840_v29, %v138_v7  ;;  %v532_v26 = vadd.f32 %v436_v13, %v166_v9  ;;  %v536_v27 = vadd.f32 %v440_v14, %v170_v10  ;;  %v172_v47 = vld [vmem:[#allocation6 + $0x30] sm:$0xff] }
  0x4a   :  { %2130 = vtanh.f32 %v567_v61  ;;  %v564_v28 = vadd.f32 %v468_v21, %v198_v11  ;;  %v568_v32 = vadd.f32 %v472_v22, %v202_v18  ;;  %v596_v33 = vadd.f32 %v500_v23, %v230_v19  ;;  %v200_v48 = vld [vmem:[#allocation6 + $0x110] sm:$0xff]  ;;  %v79_v22 = vld [vmem:[#allocation3 + $0x48] sm:$0xff] }
  0x4b   :  { %2132 = vtanh.f32 %v571_v62  ;;  %v600_v34 = vadd.f32 %v504_v24, %v234_v20  ;;  %v628_v39 = vmul.f32 0.5, %v532_v26  ;;  %v632_v40 = vmul.f32 0.5, %v536_v27  ;;  %v204_v51 = vld [vmem:[#allocation6 + $0x130] sm:$0xff]  ;;  %v83_v27 = vld [vmem:[#allocation3 + $0x68] sm:$0xff] }
  0x4c   :  { %v2115_v38 = vpop.eup %2114  ;;  %2134 = vtanh.f32 %v823_v15  ;;  %v438_v43 = vmul.f32 %v2842_v30, %v72_v25  ;;  %v820_v45 = vmul.f32 0.5, %v596_v33  ;;  %v442_v49 = vmul.f32 %v2842_v30, %v76_v31  ;;  %v232_v57 = vld [vmem:[#allocation6 + $0x210] sm:$0xff] }
  0x4d   :  { %v2117_v44 = vpop.eup %2116  ;;  %2136 = vtanh.f32 %v827_v17  ;;  %v824_v46 = vmul.f32 0.5, %v600_v34  ;;  %v470_v52 = vmul.f32 %v2842_v30, %v104_v35  ;;  %v474_v53 = vmul.f32 %v2842_v30, %v108_v36  ;;  %v236_v5 = vld [vmem:[#allocation6 + $0x230] sm:$0xff]  ;;  %v111_v34 = vld [vmem:[#allocation3 + $0x148] sm:$0xff] }
  0x4e   :  { %v2119_v50 = vpop.eup %2118  ;;  %2138 = vtanh.f32 %v628_v39  ;;  %v502_v54 = vmul.f32 %v2842_v30, %v136_v37  ;;  %v506_v58 = vmul.f32 %v2842_v30, %v140_v41  ;;  %v534_v59 = vadd.f32 %v438_v43, %v168_v42  ;;  %v143_v43 = vld [vmem:[#allocation3 + $0x248] sm:$0xff] }
  0x4f   :  { %v2121_v55 = vpop.eup %2120  ;;  %v693_v56 = vmul.f32 0.5, %v2119_v50  ;;  %2140 = vtanh.f32 %v632_v40  ;;  %v538_v62 = vadd.f32 %v442_v49, %v172_v47  ;;  %v566_v63 = vadd.f32 %v470_v52, %v200_v48  ;;  %v175_v49 = vld [vmem:[#allocation6 + $0x48] sm:$0xff] }
  0x50   :  { %v2123_v60 = vpop.eup %2122  ;;  %v697_v61 = vmul.f32 0.5, %v2121_v55  ;;  %2142 = vtanh.f32 %v564_v28  ;;  %v570_v6 = vadd.f32 %v474_v53, %v204_v51  ;;  %v598_v10 = vadd.f32 %v502_v54, %v232_v57  ;;  %v179_v50 = vld [vmem:[#allocation6 + $0x68] sm:$0xff] }
  0x51   :  { %v2125_v2 = vpop.eup %2124  ;;  %v725_v3 = vadd.f32 0.5, %v693_v56  ;;  %v885_v4 = vmul.f32 0.5, %v2123_v60  ;;  %2144 = vtanh.f32 %v568_v32  ;;  %v602_v21 = vadd.f32 %v506_v58, %v236_v5  ;;  %v207_v55 = vld [vmem:[#allocation6 + $0x148] sm:$0xff] }
  0x52   :  { %v2127_v7 = vpop.eup %2126  ;;  %v729_v8 = vadd.f32 0.5, %v697_v61  ;;  %v889_v9 = vmul.f32 0.5, %v2125_v2  ;;  %2146 = vtanh.f32 %v820_v45  ;;  %v630_v25 = vmul.f32 0.5, %v534_v59  ;;  %v211_v59 = vld [vmem:[#allocation6 + $0x168] sm:$0xff] }
  0x53   :  { %v2129_v11 = vpop.eup %2128  ;;  %v789_v13 = vmul.f32 %v2115_v38, %v725_v3  ;;  %v2862_v14 = vadd.f32 0.5, %v885_v4  ;;  %v695_v15 = vmul.f32 0.5, %v2127_v7  ;;  %2148 = vtanh.f32 %v824_v46  ;;  %v115_v38 = vld [vmem:[#allocation3 + $0x168] sm:$0xff] }
  0x54   :  { %v2131_v17 = vpop.eup %2130  ;;  %v793_v18 = vmul.f32 %v2117_v44, %v729_v8  ;;  %v2864_v19 = vadd.f32 0.5, %v889_v9  ;;  %v699_v20 = vmul.f32 0.5, %v2129_v11  ;;  %v634_v26 = vmul.f32 0.5, %v538_v62  ;;  %v147_v44 = vld [vmem:[#allocation3 + $0x268] sm:$0xff] }
  0x55   :  { %v2133_v23 = vpop.eup %2132  ;;  %2150 = vtanh.f32 %v789_v13  ;;  %v727_v24 = vadd.f32 0.5, %v695_v15  ;;  %v822_v32 = vmul.f32 0.5, %v598_v10  ;;  %v826_v33 = vmul.f32 0.5, %v602_v21  ;;  %v239_v3 = vld [vmem:[#allocation6 + $0x248] sm:$0xff] }
  0x56   :  { %v2135_v28 = vpop.eup %2134  ;;  %2152 = vtanh.f32 %v793_v18  ;;  %v731_v31 = vadd.f32 0.5, %v699_v20  ;;  %v445_v39 = vmul.f32 %v2830_v12, %v79_v22  ;;  %v449_v45 = vmul.f32 %v2830_v12, %v83_v27  ;;  %v243_v4 = vld [vmem:[#allocation6 + $0x268] sm:$0xff] }
  0x57   :  { %v2137_v35 = vpop.eup %2136  ;;  %v791_v36 = vmul.f32 %v2131_v17, %v727_v24  ;;  %v887_v37 = vmul.f32 0.5, %v2135_v28  ;;  %2154 = vtanh.f32 %v630_v25  ;;  %v477_v51 = vmul.f32 %v2830_v12, %v111_v34 }
  0x58   :  { %v2139_v40 = vpop.eup %2138  ;;  %v795_v41 = vmul.f32 %v2133_v23, %v731_v31  ;;  %v891_v42 = vmul.f32 0.5, %v2137_v35  ;;  %2156 = vtanh.f32 %v634_v26  ;;  %v481_v56 = vmul.f32 %v2830_v12, %v115_v38  ;;  %v85_v26 = vld [vmem:[#allocation3 + $0x78] sm:$0xff] }
  0x59   :  { %v2141_v46 = vpop.eup %2140  ;;  %v2868_v47 = vadd.f32 0.5, %v887_v37  ;;  %2158 = vtanh.f32 %v791_v36  ;;  %v692_v48 = vmul.f32 0.5, %v2139_v40  ;;  %v509_v60 = vmul.f32 %v2830_v12, %v143_v43  ;;  %v117_v37 = vld [vmem:[#allocation3 + $0x178] sm:$0xff] }
  0x5a   :  { %v2143_v52 = vpop.eup %2142  ;;  %v2871_v53 = vadd.f32 0.5, %v891_v42  ;;  %2160 = vtanh.f32 %v795_v41  ;;  %v696_v54 = vmul.f32 0.5, %v2141_v46  ;;  %v513_v61 = vmul.f32 %v2830_v12, %v147_v44  ;;  %v145_v41 = vld [vmem:[#allocation3 + $0x258] sm:$0xff] }
  0x5b   :  { %v2145_v57 = vpop.eup %2144  ;;  %v724_v58 = vadd.f32 0.5, %v692_v48  ;;  %2162 = vtanh.f32 %v566_v63  ;;  %v541_v5 = vadd.f32 %v445_v39, %v175_v49  ;;  %v545_v7 = vadd.f32 %v449_v45, %v179_v50  ;;  %v149_v42 = vld [vmem:[#allocation3 + $0x278] sm:$0xff] }
  0x5c   :  { %v2147_v62 = vpop.eup %2146  ;;  %v728_v2 = vadd.f32 0.5, %v696_v54  ;;  %2164 = vtanh.f32 %v570_v6  ;;  %v573_v11 = vadd.f32 %v477_v51, %v207_v55  ;;  %v577_v63 = vadd.f32 %v481_v56, %v211_v59  ;;  %v81_v6 = vld [vmem:[#allocation3 + $0x58] sm:$0xff] }
  0x5d   :  { %v2149_v8 = vpop.eup %2148  ;;  %v788_v9 = vmul.f32 %v2143_v52, %v724_v58  ;;  %v884_v10 = vmul.f32 0.5, %v2147_v62  ;;  %2166 = vtanh.f32 %v822_v32  ;;  %v605_v20 = vadd.f32 %v509_v60, %v239_v3  ;;  %v177_v46 = vld [vmem:[#allocation6 + $0x58] sm:$0xff] }
  0x5e   :  { %v792_v13 = vmul.f32 %v2145_v57, %v728_v2  ;;  %v888_v15 = vmul.f32 0.5, %v2149_v8  ;;  %2168 = vtanh.f32 %v826_v33  ;;  %v609_v21 = vadd.f32 %v513_v61, %v243_v4  ;;  %v113_v33 = vld [vmem:[#allocation3 + $0x158] sm:$0xff] }
  0x5f   :  { %v2151_v17 = vpop.eup %2150  ;;  %v2876_v18 = vadd.f32 0.5, %v884_v10  ;;  %2170 = vtanh.f32 %v788_v9  ;;  %v637_v25 = vmul.f32 0.5, %v541_v5  ;;  %v641_v31 = vmul.f32 0.5, %v545_v7  ;;  %v181_v48 = vld [vmem:[#allocation6 + $0x78] sm:$0xff] }
  0x60   :  { %v2153_v22 = vpop.eup %2152  ;;  %v981_v23 = vmul.f32 %v2151_v17, %v2862_v14  ;;  %v2879_v24 = vadd.f32 0.5, %v888_v15  ;;  %2172 = vtanh.f32 %v792_v13  ;;  %v829_v32 = vmul.f32 0.5, %v605_v20  ;;  %v209_v54 = vld [vmem:[#allocation6 + $0x158] sm:$0xff]  ;;  %v78_v15 = vld [vmem:[#allocation3 + $0x40] sm:$0xff] }
  0x61   :  { %v2155_v27 = vpop.eup %2154  ;;  %v985_v28 = vmul.f32 %v2153_v22, %v2864_v19  ;;  %2174 = vtanh.f32 %v573_v11  ;;  %v833_v36 = vmul.f32 0.5, %v609_v21  ;;  %v447_v38 = vmul.f32 %v2832_v16, %v81_v6  ;;  %v213_v58 = vld [vmem:[#allocation6 + $0x178] sm:$0xff] }
  0x62   :  { %v2157_v34 = vpop.eup %2156  ;;  %v694_v35 = vmul.f32 0.5, %v2155_v27  ;;  %2176 = vtanh.f32 %v637_v25  ;;  %v451_v43 = vmul.f32 %v2832_v16, %v85_v26  ;;  %v479_v49 = vmul.f32 %v2832_v16, %v113_v33  ;;  %v245_v59 = vld [vmem:[#allocation6 + $0x278] sm:$0xff] }
  0x63   :  { %v2159_v14 = vpop.eup %2158  ;;  %v2074_v39 = vpack.c.bf16 %v985_v28, %v981_v23  ;;  %v698_v40 = vmul.f32 0.5, %v2157_v34  ;;  %2178 = vtanh.f32 %v641_v31  ;;  %v483_v55 = vmul.f32 %v2832_v16, %v117_v37  ;;  %v110_v23 = vld [vmem:[#allocation3 + $0x140] sm:$0xff] }
  0x64   :  { %v2161_v19 = vpop.eup %2160  ;;  %v983_v44 = vmul.f32 %v2159_v14, %v2868_v47  ;;  %v726_v45 = vadd.f32 0.5, %v694_v35  ;;  %2180 = vtanh.f32 %v577_v63  ;;  %v241_v47 = vld [vmem:[#allocation6 + $0x258] sm:$0xff]  ;;  %v511_v60 = vmul.f32 %v2832_v16, %v145_v41  ;;  %v82_v63 = vld [vmem:[#allocation3 + $0x60] sm:$0xff] }
  0x65   :  { %v2163_v50 = vpop.eup %2162  ;;  %2075 = vmatprep.subr.bf16.mxu0 %v2074_v39  ;;  %v987_v51 = vmul.f32 %v2161_v19, %v2871_v53  ;;  %v730_v52 = vadd.f32 0.5, %v698_v40  ;;  %2182 = vtanh.f32 %v829_v32  ;;  %v515_v61 = vmul.f32 %v2832_v16, %v149_v42  ;;  %v114_v31 = vld [vmem:[#allocation3 + $0x160] sm:$0xff] }
  0x66   :  { %v2165_v56 = vpop.eup %2164  ;;  %v790_v57 = vmul.f32 %v2163_v50, %v726_v45  ;;  %2184 = vtanh.f32 %v833_v36  ;;  %v543_v4 = vadd.f32 %v447_v38, %v177_v46  ;;  %v547_v53 = vadd.f32 %v451_v43, %v181_v48  ;;  %v142_v32 = vld [vmem:[#allocation3 + $0x240] sm:$0xff] }
  0x67   :  { %v2167_v62 = vpop.eup %2166  ;;  %v2090_v2 = vpack.c.bf16 %v987_v51, %v983_v44  ;;  %v794_v3 = vmul.f32 %v2165_v56, %v730_v52  ;;  %v575_v8 = vadd.f32 %v479_v49, %v209_v54  ;;  %v579_v10 = vadd.f32 %v483_v55, %v213_v58  ;;  %v146_v35 = vld [vmem:[#allocation3 + $0x260] sm:$0xff] }
  0x68   :  { %v2169_v5 = vpop.eup %2168  ;;  %v886_v7 = vmul.f32 0.5, %v2167_v62  ;;  %2186 = vtanh.f32 %v790_v57  ;;  %v607_v11 = vadd.f32 %v511_v60, %v241_v47  ;;  %v611_v13 = vadd.f32 %v515_v61, %v245_v59  ;;  %v174_v36 = vld [vmem:[#allocation6 + $0x40] sm:$0xff] }
  0x69   :  { %v2171_v9 = vpop.eup %2170  ;;  %2091 = vmatprep.subr.bf16.mxu1 %v2090_v2  ;;  %2188 = vtanh.f32 %v794_v3  ;;  %v890_v21 = vmul.f32 0.5, %v2169_v5  ;;  %v639_v6 = vmul.f32 0.5, %v543_v4  ;;  %v643_v22 = vmul.f32 0.5, %v547_v53  ;;  %v178_v40 = vld [vmem:[#allocation6 + $0x60] sm:$0xff]  ;;  %v80_v4 = vld [vmem:[#allocation3 + $0x50] sm:$0xff] }
  0x6a   :  { %v2173_v17 = vpop.eup %2172  ;;  %v980_v20 = vmul.f32 %v2171_v9, %v2876_v18  ;;  %v918_v27 = vadd.f32 0.5, %v886_v7  ;;  %2190 = vtanh.f32 %v575_v8  ;;  %v831_v28 = vmul.f32 0.5, %v607_v11  ;;  %v206_v46 = vld [vmem:[#allocation6 + $0x140] sm:$0xff]  ;;  %v84_v53 = vld [vmem:[#allocation3 + $0x70] sm:$0xff] }
  0x6b   :  { %v2175_v25 = vpop.eup %2174  ;;  %v984_v26 = vmul.f32 %v2173_v17, %v2879_v24  ;;  %2192 = vtanh.f32 %v639_v6  ;;  %v835_v34 = vmul.f32 0.5, %v611_v13  ;;  %v444_v37 = vmul.f32 %v2840_v29, %v78_v15  ;;  %v238_v48 = vld [vmem:[#allocation6 + $0x240] sm:$0xff]  ;;  %v116_v11 = vld [vmem:[#allocation3 + $0x170] sm:$0xff] }
  0x6c   :  { %v2177_v33 = vpop.eup %2176  ;;  %v448_v18 = vmul.f32 %v2840_v29, %v82_v63  ;;  %2194 = vtanh.f32 %v643_v22  ;;  %v476_v24 = vmul.f32 %v2840_v29, %v110_v23  ;;  %v480_v43 = vmul.f32 %v2840_v29, %v114_v31  ;;  %v242_v49 = vld [vmem:[#allocation6 + $0x260] sm:$0xff]  ;;  %v144_v17 = vld [vmem:[#allocation3 + $0x250] sm:$0xff] }
  0x6d   :  { %v2179_v38 = vpop.eup %2178  ;;  %v2076_v14 = vpack.c.bf16 %v984_v26, %v980_v20  ;;  %v701_v39 = vmul.f32 0.5, %v2177_v33  ;;  %2196 = vtanh.f32 %v579_v10  ;;  %v508_v19 = vmul.f32 %v2840_v29, %v142_v32  ;;  %v210_v56 = vld [vmem:[#allocation6 + $0x160] sm:$0xff]  ;;  %v112_v10 = vld [vmem:[#allocation3 + $0x150] sm:$0xff] }
  0x6e   :  { %v2181_v41 = vpop.eup %2180  ;;  %v705_v42 = vmul.f32 0.5, %v2179_v38  ;;  %2198 = vtanh.f32 %v831_v28  ;;  %v512_v50 = vmul.f32 %v2840_v29, %v146_v35  ;;  %v540_v51 = vadd.f32 %v444_v37, %v174_v36  ;;  %v148_v20 = vld [vmem:[#allocation3 + $0x270] sm:$0xff] }
  0x6f   :  { %v2183_v44 = vpop.eup %2182  ;;  %2077 = vmatpush1.bf16.msra.mxu0 %v2076_v14  ;;  %v733_v45 = vadd.f32 0.5, %v701_v39  ;;  %v922_v54 = vadd.f32 0.5, %v890_v21  ;;  %2200 = vtanh.f32 %v835_v34  ;;  %v544_v57 = vadd.f32 %v448_v18, %v178_v40  ;;  %v176_v22 = vld [vmem:[#allocation6 + $0x50] sm:$0xff] }
  0x70   :  { %v2185_v52 = vpop.eup %2184  ;;  %v737_v55 = vadd.f32 0.5, %v705_v42  ;;  %v893_v47 = vmul.f32 0.5, %v2183_v44  ;;  %v572_v62 = vadd.f32 %v476_v24, %v206_v46  ;;  %v604_v2 = vadd.f32 %v508_v19, %v238_v48  ;;  %v180_v23 = vld [vmem:[#allocation6 + $0x70] sm:$0xff] }
  0x71   :  { %v797_v58 = vmul.f32 %v2175_v25, %v733_v45  ;;  %v897_v59 = vmul.f32 0.5, %v2185_v52  ;;  %v608_v3 = vadd.f32 %v512_v50, %v242_v49  ;;  %v576_v8 = vadd.f32 %v480_v43, %v210_v56  ;;  %v208_v31 = vld [vmem:[#allocation6 + $0x150] sm:$0xff]  ;;  %v91_v56 = vld [vmem:[#allocation3 + $0xa8] sm:$0xff] }
  0x72   :  { %v2187_v60 = vpop.eup %2186  ;;  %v801_v61 = vmul.f32 %v2181_v41, %v737_v55  ;;  %v636_v9 = vmul.f32 0.5, %v540_v51  ;;  %v640_v15 = vmul.f32 0.5, %v544_v57  ;;  %v828_v63 = vmul.f32 0.5, %v604_v2  ;;  %v240_v36 = vld [vmem:[#allocation6 + $0x250] sm:$0xff]  ;;  %v87_v55 = vld [vmem:[#allocation3 + $0x88] sm:$0xff] }
  0x73   :  { %v2189_v5 = vpop.eup %2188  ;;  %v982_v7 = vmul.f32 %v2187_v60, %v918_v27  ;;  %2202 = vtanh.f32 %v797_v58  ;;  %v832_v6 = vmul.f32 0.5, %v608_v3  ;;  %v446_v25 = vmul.f32 %v2842_v30, %v80_v4  ;;  %v212_v39 = vld [vmem:[#allocation6 + $0x170] sm:$0xff]  ;;  %v151_v4 = vld [vmem:[#allocation3 + $0x288] sm:$0xff] }
  0x74   :  { %v986_v13 = vmul.f32 %v2189_v5, %v922_v54  ;;  %2204 = vtanh.f32 %v801_v61  ;;  %v2191_v21 = vpop.eup %2190  ;;  %v450_v26 = vmul.f32 %v2842_v30, %v84_v53  ;;  %v478_v32 = vmul.f32 %v2842_v30, %v112_v10  ;;  %v244_v40 = vld [vmem:[#allocation6 + $0x270] sm:$0xff]  ;;  %v119_v61 = vld [vmem:[#allocation3 + $0x188] sm:$0xff] }
  0x75   :  { %2206 = vtanh.f32 %v636_v9  ;;  %v2193_v27 = vpop.eup %2192  ;;  %v482_v33 = vmul.f32 %v2842_v30, %v116_v11  ;;  %v510_v37 = vmul.f32 %v2842_v30, %v144_v17  ;;  %v514_v18 = vmul.f32 %v2842_v30, %v148_v20  ;;  %v155_v53 = vld [vmem:[#allocation3 + $0x2a8] sm:$0xff] }
  0x76   :  { %v2092_v28 = vpack.c.bf16 %v986_v13, %v982_v7  ;;  %2208 = vtanh.f32 %v640_v15  ;;  %v2195_v34 = vpop.eup %2194  ;;  %v703_v35 = vmul.f32 0.5, %v2193_v27  ;;  %v542_v24 = vadd.f32 %v446_v25, %v176_v22  ;;  %v187_v15 = vld [vmem:[#allocation6 + $0xa8] sm:$0xff] }
  0x77   :  { %2210 = vtanh.f32 %v572_v62  ;;  %v2197_v38 = vpop.eup %2196  ;;  %v707_v14 = vmul.f32 0.5, %v2195_v34  ;;  %v546_v41 = vadd.f32 %v450_v26, %v180_v23  ;;  %v925_v43 = vadd.f32 0.5, %v893_v47  ;;  %v123_v47 = vld [vmem:[#allocation3 + $0x1a8] sm:$0xff] }
  0x78   :  { %2093 = vmatpush1.bf16.msra.mxu1 %v2092_v28  ;;  %2212 = vtanh.f32 %v576_v8  ;;  %v2199_v42 = vpop.eup %2198  ;;  %v735_v19 = vadd.f32 0.5, %v703_v35  ;;  %v574_v44 = vadd.f32 %v478_v32, %v208_v31  ;;  %v929_v46 = vadd.f32 0.5, %v897_v59  ;;  %v183_v8 = vld [vmem:[#allocation6 + $0x88] sm:$0xff] }
  0x79   :  { %2214 = vtanh.f32 %v828_v63  ;;  %v2201_v45 = vpop.eup %2200  ;;  %v739_v48 = vadd.f32 0.5, %v707_v14  ;;  %v606_v49 = vadd.f32 %v510_v37, %v240_v36  ;;  %v578_v51 = vadd.f32 %v482_v33, %v212_v39  ;;  %v215_v63 = vld [vmem:[#allocation6 + $0x188] sm:$0xff] }
  0x7a   :  { %2216 = vtanh.f32 %v832_v6  ;;  %v799_v50 = vmul.f32 %v2191_v21, %v735_v19  ;;  %v610_v52 = vadd.f32 %v514_v18, %v244_v40  ;;  %v638_v54 = vmul.f32 0.5, %v542_v24  ;;  %v247_v22 = vld [vmem:[#allocation6 + $0x288] sm:$0xff]  ;;  %v89_v19 = vld [vmem:[#allocation3 + $0x98] sm:$0xff] }
  0x7b   :  { %v803_v57 = vmul.f32 %v2197_v38, %v739_v48  ;;  %v895_v58 = vmul.f32 0.5, %v2199_v42  ;;  %v642_v60 = vmul.f32 0.5, %v546_v41  ;;  %2218 = vtanh.f32 %v574_v44  ;;  %v251_v31 = vld [vmem:[#allocation6 + $0x2a8] sm:$0xff]  ;;  %v93_v44 = vld [vmem:[#allocation3 + $0xb8] sm:$0xff] }
  0x7c   :  { %v899_v2 = vmul.f32 0.5, %v2201_v45  ;;  %2220 = vtanh.f32 %v799_v50  ;;  %v830_v3 = vmul.f32 0.5, %v606_v49  ;;  %v834_v59 = vmul.f32 0.5, %v610_v52  ;;  %v219_v35 = vld [vmem:[#allocation6 + $0x1a8] sm:$0xff]  ;;  %v121_v49 = vld [vmem:[#allocation3 + $0x198] sm:$0xff] }
  0x7d   :  { %v2203_v62 = vpop.eup %2202  ;;  %2222 = vtanh.f32 %v803_v57  ;;  %v453_v9 = vmul.f32 %v2830_v12, %v87_v55  ;;  %v457_v10 = vmul.f32 %v2830_v12, %v91_v56  ;;  %v485_v17 = vmul.f32 %v2830_v12, %v119_v61  ;;  %v125_v50 = vld [vmem:[#allocation3 + $0x1b8] sm:$0xff] }
  0x7e   :  { %v2205_v5 = vpop.eup %2204  ;;  %v989_v7 = vmul.f32 %v2203_v62, %v925_v43  ;;  %2224 = vtanh.f32 %v638_v54  ;;  %v489_v20 = vmul.f32 %v2830_v12, %v123_v47  ;;  %v517_v23 = vmul.f32 %v2830_v12, %v151_v4  ;;  %v153_v56 = vld [vmem:[#allocation3 + $0x298] sm:$0xff] }
  0x7f   :  { %v2207_v11 = vpop.eup %2206  ;;  %v993_v13 = vmul.f32 %v2205_v5, %v929_v46  ;;  %2226 = vtanh.f32 %v642_v60  ;;  %v521_v25 = vmul.f32 %v2830_v12, %v155_v53  ;;  %v549_v32 = vadd.f32 %v453_v9, %v183_v8  ;;  %v157_v57 = vld [vmem:[#allocation3 + $0x2b8] sm:$0xff] }
  0x80   :  { %v2209_v21 = vpop.eup %2208  ;;  %v700_v6 = vmul.f32 0.5, %v2207_v11  ;;  %2228 = vtanh.f32 %v578_v51  ;;  %v553_v36 = vadd.f32 %v457_v10, %v187_v15  ;;  %v581_v37 = vadd.f32 %v485_v17, %v215_v63  ;;  %v185_v61 = vld [vmem:[#allocation6 + $0x98] sm:$0xff] }
  0x81   :  { %v2211_v26 = vpop.eup %2210  ;;  %v2078_v27 = vpack.c.bf16 %v993_v13, %v989_v7  ;;  %v704_v28 = vmul.f32 0.5, %v2209_v21  ;;  %2230 = vtanh.f32 %v830_v3  ;;  %v927_v38 = vadd.f32 0.5, %v895_v58  ;;  %v189_v47 = vld [vmem:[#allocation6 + $0xb8] sm:$0xff] }
  0x82   :  { %v2213_v33 = vpop.eup %2212  ;;  %v732_v34 = vadd.f32 0.5, %v700_v6  ;;  %2232 = vtanh.f32 %v834_v59  ;;  %v613_v39 = vadd.f32 %v517_v23, %v247_v22  ;;  %v931_v24 = vadd.f32 0.5, %v899_v2  ;;  %v217_v4 = vld [vmem:[#allocation6 + $0x198] sm:$0xff] }
  0x83   :  { %v2215_v18 = vpop.eup %2214  ;;  %2079 = vmatprep.subr.bf16.mxu0 %v2078_v27  ;;  %v736_v14 = vadd.f32 0.5, %v704_v28  ;;  %v617_v42 = vadd.f32 %v521_v25, %v251_v31  ;;  %v645_v43 = vmul.f32 0.5, %v549_v32  ;;  %v585_v46 = vadd.f32 %v489_v20, %v219_v35  ;;  %v249_v9 = vld [vmem:[#allocation6 + $0x298] sm:$0xff] }
  0x84   :  { %v2217_v40 = vpop.eup %2216  ;;  %v796_v41 = vmul.f32 %v2211_v26, %v732_v34  ;;  %v649_v48 = vmul.f32 0.5, %v553_v36  ;;  %2234 = vtanh.f32 %v581_v37  ;;  %v892_v52 = vmul.f32 0.5, %v2215_v18  ;;  %v253_v63 = vld [vmem:[#allocation6 + $0x2b8] sm:$0xff]  ;;  %v86_v37 = vld [vmem:[#allocation3 + $0x80] sm:$0xff] }
  0x85   :  { %v800_v45 = vmul.f32 %v2213_v33, %v736_v14  ;;  %v2219_v51 = vpop.eup %2218  ;;  %v896_v54 = vmul.f32 0.5, %v2217_v40  ;;  %v837_v55 = vmul.f32 0.5, %v613_v39  ;;  %v841_v60 = vmul.f32 0.5, %v617_v42  ;;  %v221_v23 = vld [vmem:[#allocation6 + $0x1b8] sm:$0xff]  ;;  %v90_v39 = vld [vmem:[#allocation3 + $0xa0] sm:$0xff] }
  0x86   :  { %2236 = vtanh.f32 %v796_v41  ;;  %v2221_v58 = vpop.eup %2220  ;;  %v455_v62 = vmul.f32 %v2832_v16, %v89_v19  ;;  %v459_v2 = vmul.f32 %v2832_v16, %v93_v44  ;;  %v487_v53 = vmul.f32 %v2832_v16, %v121_v49  ;;  %v118_v40 = vld [vmem:[#allocation3 + $0x180] sm:$0xff] }
  0x87   :  { %2238 = vtanh.f32 %v800_v45  ;;  %v2223_v3 = vpop.eup %2222  ;;  %v991_v59 = vmul.f32 %v2221_v58, %v927_v38  ;;  %v491_v5 = vmul.f32 %v2832_v16, %v125_v50  ;;  %v519_v10 = vmul.f32 %v2832_v16, %v153_v56  ;;  %v122_v19 = vld [vmem:[#allocation3 + $0x1a0] sm:$0xff] }
  0x88   :  { %2240 = vtanh.f32 %v645_v43  ;;  %v2225_v7 = vpop.eup %2224  ;;  %v995_v8 = vmul.f32 %v2223_v3, %v931_v24  ;;  %v523_v11 = vmul.f32 %v2832_v16, %v157_v57  ;;  %v551_v17 = vadd.f32 %v455_v62, %v185_v61  ;;  %v150_v44 = vld [vmem:[#allocation3 + $0x280] sm:$0xff] }
  0x89   :  { %2242 = vtanh.f32 %v649_v48  ;;  %v2227_v13 = vpop.eup %2226  ;;  %v702_v15 = vmul.f32 0.5, %v2225_v7  ;;  %v555_v20 = vadd.f32 %v459_v2, %v189_v47  ;;  %v583_v25 = vadd.f32 %v487_v53, %v217_v4  ;;  %v154_v49 = vld [vmem:[#allocation3 + $0x2a0] sm:$0xff] }
  0x8a   :  { %2244 = vtanh.f32 %v585_v46  ;;  %v2229_v21 = vpop.eup %2228  ;;  %v2094_v6 = vpack.c.bf16 %v995_v8, %v991_v59  ;;  %v706_v22 = vmul.f32 0.5, %v2227_v13  ;;  %v924_v27 = vadd.f32 0.5, %v892_v52  ;;  %v182_v50 = vld [vmem:[#allocation6 + $0x80] sm:$0xff] }
  0x8b   :  { %2246 = vtanh.f32 %v837_v55  ;;  %v2231_v26 = vpop.eup %2230  ;;  %v734_v28 = vadd.f32 0.5, %v702_v15  ;;  %v615_v31 = vadd.f32 %v519_v10, %v249_v9  ;;  %v928_v33 = vadd.f32 0.5, %v896_v54  ;;  %v186_v55 = vld [vmem:[#allocation6 + $0xa0] sm:$0xff] }
  0x8c   :  { %2248 = vtanh.f32 %v841_v60  ;;  %v2233_v32 = vpop.eup %2232  ;;  %2095 = vmatprep.subr.bf16.mxu1 %v2094_v6  ;;  %v738_v34 = vadd.f32 0.5, %v706_v22  ;;  %v619_v35 = vadd.f32 %v523_v11, %v253_v63  ;;  %v647_v36 = vmul.f32 0.5, %v551_v17  ;;  %v214_v61 = vld [vmem:[#allocation6 + $0x180] sm:$0xff] }
  0x8d   :  { %v798_v18 = vmul.f32 %v2219_v51, %v734_v28  ;;  %v587_v38 = vadd.f32 %v491_v5, %v221_v23  ;;  %v651_v14 = vmul.f32 0.5, %v555_v20  ;;  %2250 = vtanh.f32 %v583_v25  ;;  %v246_v59 = vld [vmem:[#allocation6 + $0x280] sm:$0xff]  ;;  %v88_v25 = vld [vmem:[#allocation3 + $0x90] sm:$0xff] }
  0x8e   :  { %v2235_v24 = vpop.eup %2234  ;;  %v802_v41 = vmul.f32 %v2229_v21, %v738_v34  ;;  %v894_v42 = vmul.f32 0.5, %v2231_v26  ;;  %v898_v43 = vmul.f32 0.5, %v2233_v32  ;;  %2252 = vtanh.f32 %v647_v36  ;;  %v250_v4 = vld [vmem:[#allocation6 + $0x2a0] sm:$0xff]  ;;  %v92_v32 = vld [vmem:[#allocation3 + $0xb0] sm:$0xff] }
  0x8f   :  { %2254 = vtanh.f32 %v798_v18  ;;  %v839_v46 = vmul.f32 0.5, %v615_v31  ;;  %v843_v48 = vmul.f32 0.5, %v619_v35  ;;  %v452_v51 = vmul.f32 %v2840_v29, %v86_v37  ;;  %v218_v10 = vld [vmem:[#allocation6 + $0x1a0] sm:$0xff]  ;;  %v124_v18 = vld [vmem:[#allocation3 + $0x1b0] sm:$0xff] }
  0x90   :  { %v2237_v45 = vpop.eup %2236  ;;  %2256 = vtanh.f32 %v802_v41  ;;  %v456_v56 = vmul.f32 %v2840_v29, %v90_v39  ;;  %v484_v57 = vmul.f32 %v2840_v29, %v118_v40  ;;  %v488_v47 = vmul.f32 %v2840_v29, %v122_v19  ;;  %v156_v41 = vld [vmem:[#allocation3 + $0x2b0] sm:$0xff] }
  0x91   :  { %v2239_v52 = vpop.eup %2238  ;;  %v988_v54 = vmul.f32 %v2237_v45, %v924_v27  ;;  %2258 = vtanh.f32 %v651_v14  ;;  %v516_v62 = vmul.f32 %v2840_v29, %v150_v44  ;;  %v520_v53 = vmul.f32 %v2840_v29, %v154_v49  ;;  %v184_v19 = vld [vmem:[#allocation6 + $0x90] sm:$0xff] }
  0x92   :  { %v2241_v58 = vpop.eup %2240  ;;  %v992_v60 = vmul.f32 %v2239_v52, %v928_v33  ;;  %2260 = vtanh.f32 %v587_v38  ;;  %v548_v5 = vadd.f32 %v452_v51, %v182_v50  ;;  %v552_v11 = vadd.f32 %v456_v56, %v186_v55  ;;  %v120_v33 = vld [vmem:[#allocation3 + $0x190] sm:$0xff] }
  0x93   :  { %v2243_v2 = vpop.eup %2242  ;;  %v709_v3 = vmul.f32 0.5, %v2241_v58  ;;  %2262 = vtanh.f32 %v839_v46  ;;  %v926_v15 = vadd.f32 0.5, %v894_v42  ;;  %v580_v17 = vadd.f32 %v484_v57, %v214_v61  ;;  %v152_v38 = vld [vmem:[#allocation3 + $0x290] sm:$0xff] }
  0x94   :  { %v2245_v7 = vpop.eup %2244  ;;  %v2080_v8 = vpack.c.bf16 %v992_v60, %v988_v54  ;;  %v713_v9 = vmul.f32 0.5, %v2243_v2  ;;  %2264 = vtanh.f32 %v843_v48  ;;  %v930_v21 = vadd.f32 0.5, %v898_v43  ;;  %v188_v44 = vld [vmem:[#allocation6 + $0xb0] sm:$0xff] }
  0x95   :  { %v2247_v13 = vpop.eup %2246  ;;  %v741_v63 = vadd.f32 0.5, %v709_v3  ;;  %v612_v22 = vadd.f32 %v516_v62, %v246_v59  ;;  %v616_v23 = vadd.f32 %v520_v53, %v250_v4  ;;  %v584_v28 = vadd.f32 %v488_v47, %v218_v10  ;;  %v216_v50 = vld [vmem:[#allocation6 + $0x190] sm:$0xff] }
  0x96   :  { %v2249_v20 = vpop.eup %2248  ;;  %2081 = vmatpush1.bf16.msra.mxu0 %v2080_v8  ;;  %v745_v6 = vadd.f32 0.5, %v713_v9  ;;  %v901_v27 = vmul.f32 0.5, %v2247_v13  ;;  %v644_v31 = vmul.f32 0.5, %v548_v5  ;;  %v648_v37 = vmul.f32 0.5, %v552_v11  ;;  %v248_v61 = vld [vmem:[#allocation6 + $0x290] sm:$0xff] }
  0x97   :  { %v805_v26 = vmul.f32 %v2235_v24, %v741_v63  ;;  %v2251_v34 = vpop.eup %2250  ;;  %v905_v36 = vmul.f32 0.5, %v2249_v20  ;;  %2266 = vtanh.f32 %v580_v17  ;;  %v836_v39 = vmul.f32 0.5, %v612_v22  ;;  %v252_v47 = vld [vmem:[#allocation6 + $0x2b0] sm:$0xff]  ;;  %v95_v63 = vld [vmem:[#allocation3 + $0xc8] sm:$0xff] }
  0x98   :  { %v809_v35 = vmul.f32 %v2245_v7, %v745_v6  ;;  %v2253_v14 = vpop.eup %2252  ;;  %v840_v40 = vmul.f32 0.5, %v616_v23  ;;  %v454_v42 = vmul.f32 %v2842_v30, %v88_v25  ;;  %v458_v45 = vmul.f32 %v2842_v30, %v92_v32  ;;  %v220_v53 = vld [vmem:[#allocation6 + $0x1b0] sm:$0xff]  ;;  %v99_v17 = vld [vmem:[#allocation3 + $0xe8] sm:$0xff] }
  0x99   :  { %2268 = vtanh.f32 %v805_v26  ;;  %v2255_v24 = vpop.eup %2254  ;;  %v711_v43 = vmul.f32 0.5, %v2253_v14  ;;  %v486_v46 = vmul.f32 %v2842_v30, %v120_v33  ;;  %v490_v51 = vmul.f32 %v2842_v30, %v124_v18  ;;  %v127_v20 = vld [vmem:[#allocation3 + $0x1c8] sm:$0xff] }
  0x9a   :  { %2270 = vtanh.f32 %v809_v35  ;;  %v2257_v48 = vpop.eup %2256  ;;  %v990_v49 = vmul.f32 %v2255_v24, %v926_v15  ;;  %v518_v52 = vmul.f32 %v2842_v30, %v152_v38  ;;  %v522_v57 = vmul.f32 %v2842_v30, %v156_v41  ;;  %v131_v25 = vld [vmem:[#allocation3 + $0x1e8] sm:$0xff] }
  0x9b   :  { %2272 = vtanh.f32 %v644_v31  ;;  %v2259_v54 = vpop.eup %2258  ;;  %v994_v55 = vmul.f32 %v2257_v48, %v930_v21  ;;  %v743_v56 = vadd.f32 0.5, %v711_v43  ;;  %v550_v62 = vadd.f32 %v454_v42, %v184_v19  ;;  %v159_v26 = vld [vmem:[#allocation3 + $0x2c8] sm:$0xff] }
  0x9c   :  { %2274 = vtanh.f32 %v648_v37  ;;  %v2261_v58 = vpop.eup %2260  ;;  %v715_v60 = vmul.f32 0.5, %v2259_v54  ;;  %v554_v2 = vadd.f32 %v458_v45, %v188_v44  ;;  %v582_v5 = vadd.f32 %v486_v46, %v216_v50  ;;  %v163_v33 = vld [vmem:[#allocation3 + $0x2e8] sm:$0xff] }
  0x9d   :  { %2276 = vtanh.f32 %v584_v28  ;;  %v2263_v3 = vpop.eup %2262  ;;  %v2096_v59 = vpack.c.bf16 %v994_v55, %v990_v49  ;;  %v807_v4 = vmul.f32 %v2251_v34, %v743_v56  ;;  %v933_v8 = vadd.f32 0.5, %v901_v27  ;;  %v191_v34 = vld [vmem:[#allocation6 + $0xc8] sm:$0xff] }
  0x9e   :  { %2278 = vtanh.f32 %v836_v39  ;;  %v2265_v7 = vpop.eup %2264  ;;  %v937_v9 = vadd.f32 0.5, %v905_v36  ;;  %v747_v10 = vadd.f32 0.5, %v715_v60  ;;  %v903_v11 = vmul.f32 0.5, %v2263_v3  ;;  %v195_v36 = vld [vmem:[#allocation6 + $0xe8] sm:$0xff] }
  0x9f   :  { %2280 = vtanh.f32 %v840_v40  ;;  %2097 = vmatpush1.bf16.msra.mxu1 %v2096_v59  ;;  %v614_v13 = vadd.f32 %v518_v52, %v248_v61  ;;  %v618_v15 = vadd.f32 %v522_v57, %v252_v47  ;;  %v586_v6 = vadd.f32 %v490_v51, %v220_v53  ;;  %v223_v37 = vld [vmem:[#allocation6 + $0x1c8] sm:$0xff]  ;;  %v97_v59 = vld [vmem:[#allocation3 + $0xd8] sm:$0xff] }
  0xa0   :  { %2282 = vtanh.f32 %v807_v4  ;;  %v811_v21 = vmul.f32 %v2261_v58, %v747_v10  ;;  %v646_v22 = vmul.f32 0.5, %v550_v62  ;;  %v650_v23 = vmul.f32 0.5, %v554_v2  ;;  %v255_v19 = vld [vmem:[#allocation6 + $0x2c8] sm:$0xff] }
  0xa1   :  { %v2267_v28 = vpop.eup %2266  ;;  %v907_v31 = vmul.f32 0.5, %v2265_v7  ;;  %2284 = vtanh.f32 %v582_v5  ;;  %v838_v27 = vmul.f32 0.5, %v614_v13  ;;  %v842_v32 = vmul.f32 0.5, %v618_v15  ;;  %v259_v49 = vld [vmem:[#allocation6 + $0x2e8] sm:$0xff]  ;;  %v133_v15 = vld [vmem:[#allocation3 + $0x1f8] sm:$0xff] }
  0xa2   :  { %2286 = vtanh.f32 %v811_v21  ;;  %v461_v18 = vmul.f32 %v2830_v12, %v95_v63  ;;  %v465_v38 = vmul.f32 %v2830_v12, %v99_v17  ;;  %v493_v14 = vmul.f32 %v2830_v12, %v127_v20  ;;  %v227_v56 = vld [vmem:[#allocation6 + $0x1e8] sm:$0xff]  ;;  %v161_v63 = vld [vmem:[#allocation3 + $0x2d8] sm:$0xff] }
  0xa3   :  { %v2269_v35 = vpop.eup %2268  ;;  %2288 = vtanh.f32 %v646_v22  ;;  %v497_v41 = vmul.f32 %v2830_v12, %v131_v25  ;;  %v525_v42 = vmul.f32 %v2830_v12, %v159_v26  ;;  %v529_v44 = vmul.f32 %v2830_v12, %v163_v33  ;;  %v193_v22 = vld [vmem:[#allocation6 + $0xd8] sm:$0xff] }
  0xa4   :  { %v2271_v39 = vpop.eup %2270  ;;  %v997_v40 = vmul.f32 %v2269_v35, %v933_v8  ;;  %2290 = vtanh.f32 %v650_v23  ;;  %v557_v45 = vadd.f32 %v461_v18, %v191_v34  ;;  %v561_v50 = vadd.f32 %v465_v38, %v195_v36  ;;  %v101_v8 = vld [vmem:[#allocation3 + $0xf8] sm:$0xff] }
  0xa5   :  { %v2273_v24 = vpop.eup %2272  ;;  %v1001_v43 = vmul.f32 %v2271_v39, %v937_v9  ;;  %2292 = vtanh.f32 %v586_v6  ;;  %v589_v51 = vadd.f32 %v493_v14, %v223_v37  ;;  %v935_v58 = vadd.f32 0.5, %v903_v11  ;;  %v129_v9 = vld [vmem:[#allocation3 + $0x1d8] sm:$0xff] }
  0xa6   :  { %v2275_v46 = vpop.eup %2274  ;;  %v708_v48 = vmul.f32 0.5, %v2273_v24  ;;  %2294 = vtanh.f32 %v838_v27  ;;  %v621_v61 = vadd.f32 %v525_v42, %v255_v19  ;;  %v939_v12 = vadd.f32 0.5, %v907_v31  ;;  %v165_v6 = vld [vmem:[#allocation3 + $0x2f8] sm:$0xff] }
  0xa7   :  { %v2277_v52 = vpop.eup %2276  ;;  %v2082_v54 = vpack.c.bf16 %v1001_v43, %v997_v40  ;;  %v712_v55 = vmul.f32 0.5, %v2275_v46  ;;  %2296 = vtanh.f32 %v842_v32  ;;  %v625_v2 = vadd.f32 %v529_v44, %v259_v49  ;;  %v197_v23 = vld [vmem:[#allocation6 + $0xf8] sm:$0xff] }
  0xa8   :  { %v2279_v57 = vpop.eup %2278  ;;  %v740_v60 = vadd.f32 0.5, %v708_v48  ;;  %v653_v3 = vmul.f32 0.5, %v557_v45  ;;  %v593_v5 = vadd.f32 %v497_v41, %v227_v56  ;;  %v657_v7 = vmul.f32 0.5, %v561_v50  ;;  %v225_v31 = vld [vmem:[#allocation6 + $0x1d8] sm:$0xff] }
  0xa9   :  { %v2281_v47 = vpop.eup %2280  ;;  %2083 = vmatprep.subr.bf16.mxu0 %v2082_v54  ;;  %v744_v62 = vadd.f32 0.5, %v712_v55  ;;  %2298 = vtanh.f32 %v589_v51  ;;  %v900_v13 = vmul.f32 0.5, %v2279_v57  ;;  %v845_v21 = vmul.f32 0.5, %v621_v61  ;;  %v257_v35 = vld [vmem:[#allocation6 + $0x2d8] sm:$0xff]  ;;  %v94_v54 = vld [vmem:[#allocation3 + $0xc0] sm:$0xff] }
  0xaa   :  { %v2283_v4 = vpop.eup %2282  ;;  %v804_v53 = vmul.f32 %v2267_v28, %v740_v60  ;;  %v904_v11 = vmul.f32 0.5, %v2281_v47  ;;  %2300 = vtanh.f32 %v653_v3  ;;  %v463_v25 = vmul.f32 %v2832_v16, %v97_v59  ;;  %v261_v43 = vld [vmem:[#allocation6 + $0x2f8] sm:$0xff]  ;;  %v126_v60 = vld [vmem:[#allocation3 + $0x1c0] sm:$0xff] }
  0xab   :  { %v808_v10 = vmul.f32 %v2277_v52, %v744_v62  ;;  %v2285_v17 = vpop.eup %2284  ;;  %v999_v20 = vmul.f32 %v2283_v4, %v935_v58  ;;  %v849_v28 = vmul.f32 0.5, %v625_v2  ;;  %v467_v27 = vmul.f32 %v2832_v16, %v101_v8  ;;  %v229_v48 = vld [vmem:[#allocation6 + $0x1f8] sm:$0xff]  ;;  %v98_v58 = vld [vmem:[#allocation3 + $0xe0] sm:$0xff] }
  0xac   :  { %2302 = vtanh.f32 %v804_v53  ;;  %v2287_v26 = vpop.eup %2286  ;;  %v495_v32 = vmul.f32 %v2832_v16, %v129_v9  ;;  %v499_v36 = vmul.f32 %v2832_v16, %v133_v15  ;;  %v527_v37 = vmul.f32 %v2832_v16, %v161_v63  ;;  %v130_v2 = vld [vmem:[#allocation3 + $0x1e0] sm:$0xff] }
  0xad   :  { %2304 = vtanh.f32 %v808_v10  ;;  %v2289_v33 = vpop.eup %2288  ;;  %v1003_v34 = vmul.f32 %v2287_v26, %v939_v12  ;;  %v531_v14 = vmul.f32 %v2832_v16, %v165_v6  ;;  %v559_v39 = vadd.f32 %v463_v25, %v193_v22  ;;  %v158_v53 = vld [vmem:[#allocation3 + $0x2c0] sm:$0xff] }
  0xae   :  { %2306 = vtanh.f32 %v657_v7  ;;  %v2291_v18 = vpop.eup %2290  ;;  %v710_v38 = vmul.f32 0.5, %v2289_v33  ;;  %v563_v40 = vadd.f32 %v467_v27, %v197_v23  ;;  %v591_v19 = vadd.f32 %v495_v32, %v225_v31  ;;  %v162_v9 = vld [vmem:[#allocation3 + $0x2e0] sm:$0xff] }
  0xaf   :  { %v2293_v41 = vpop.eup %2292  ;;  %v2098_v42 = vpack.c.bf16 %v1003_v34, %v999_v20  ;;  %v714_v24 = vmul.f32 0.5, %v2291_v18  ;;  %2308 = vtanh.f32 %v593_v5  ;;  %v932_v45 = vadd.f32 0.5, %v900_v13  ;;  %v190_v10 = vld [vmem:[#allocation6 + $0xc0] sm:$0xff] }
  0xb0   :  { %v2295_v44 = vpop.eup %2294  ;;  %v742_v46 = vadd.f32 0.5, %v710_v38  ;;  %2310 = vtanh.f32 %v845_v21  ;;  %v623_v49 = vadd.f32 %v527_v37, %v257_v35  ;;  %v936_v51 = vadd.f32 0.5, %v904_v11  ;;  %v194_v13 = vld [vmem:[#allocation6 + $0xe0] sm:$0xff] }
  0xb1   :  { %v2297_v50 = vpop.eup %2296  ;;  %2099 = vmatprep.subr.bf16.mxu1 %v2098_v42  ;;  %v746_v52 = vadd.f32 0.5, %v714_v24  ;;  %2312 = vtanh.f32 %v849_v28  ;;  %v655_v16 = vmul.f32 0.5, %v559_v39  ;;  %v627_v56 = vadd.f32 %v531_v14, %v261_v43  ;;  %v222_v21 = vld [vmem:[#allocation6 + $0x1c0] sm:$0xff] }
  0xb2   :  { %v806_v55 = vmul.f32 %v2285_v17, %v742_v46  ;;  %v659_v57 = vmul.f32 0.5, %v563_v40  ;;  %2314 = vtanh.f32 %v591_v19  ;;  %v902_v12 = vmul.f32 0.5, %v2295_v44  ;;  %v254_v31 = vld [vmem:[#allocation6 + $0x2c0] sm:$0xff]  ;;  %v100_v19 = vld [vmem:[#allocation3 + $0xf0] sm:$0xff] }
  0xb3   :  { %v2299_v61 = vpop.eup %2298  ;;  %v810_v47 = vmul.f32 %v2293_v41, %v746_v52  ;;  %v595_v62 = vadd.f32 %v499_v36, %v229_v48  ;;  %2316 = vtanh.f32 %v655_v16  ;;  %v906_v59 = vmul.f32 0.5, %v2297_v50  ;;  %v258_v37 = vld [vmem:[#allocation6 + $0x2e0] sm:$0xff]  ;;  %v128_v52 = vld [vmem:[#allocation3 + $0x1d0] sm:$0xff] }
  0xb4   :  { %v2301_v3 = vpop.eup %2300  ;;  %2318 = vtanh.f32 %v806_v55  ;;  %v847_v4 = vmul.f32 0.5, %v623_v49  ;;  %v460_v5 = vmul.f32 %v2840_v29, %v94_v54  ;;  %v464_v11 = vmul.f32 %v2840_v29, %v98_v58  ;;  %v226_v40 = vld [vmem:[#allocation6 + $0x1e0] sm:$0xff]  ;;  %v160_v55 = vld [vmem:[#allocation3 + $0x2d0] sm:$0xff] }
  0xb5   :  { %2320 = vtanh.f32 %v810_v47  ;;  %v717_v8 = vmul.f32 0.5, %v2301_v3  ;;  %v492_v15 = vmul.f32 %v2840_v29, %v126_v60  ;;  %v851_v20 = vmul.f32 0.5, %v627_v56  ;;  %v192_v56 = vld [vmem:[#allocation6 + $0xd0] sm:$0xff] }
  0xb6   :  { %v2303_v7 = vpop.eup %2302  ;;  %2322 = vtanh.f32 %v659_v57  ;;  %v496_v6 = vmul.f32 %v2840_v29, %v130_v2  ;;  %v524_v26 = vmul.f32 %v2840_v29, %v158_v53  ;;  %v528_v27 = vmul.f32 %v2840_v29, %v162_v9  ;;  %v96_v29 = vld [vmem:[#allocation3 + $0xd0] sm:$0xff] }
  0xb7   :  { %v2305_v63 = vpop.eup %2304  ;;  %v996_v17 = vmul.f32 %v2303_v7, %v932_v45  ;;  %v749_v25 = vadd.f32 0.5, %v717_v8  ;;  %2324 = vtanh.f32 %v595_v62  ;;  %v556_v32 = vadd.f32 %v460_v5, %v190_v10  ;;  %v132_v62 = vld [vmem:[#allocation3 + $0x1f0] sm:$0xff] }
  0xb8   :  { %v2307_v22 = vpop.eup %2306  ;;  %v1000_v23 = vmul.f32 %v2305_v63, %v936_v51  ;;  %v560_v33 = vadd.f32 %v464_v11, %v194_v13  ;;  %2326 = vtanh.f32 %v847_v4  ;;  %v588_v18 = vadd.f32 %v492_v15, %v222_v21  ;;  %v196_v2 = vld [vmem:[#allocation6 + $0xf0] sm:$0xff] }
  0xb9   :  { %v721_v28 = vmul.f32 0.5, %v2307_v22  ;;  %v2309_v34 = vpop.eup %2308  ;;  %v813_v36 = vmul.f32 %v2299_v61, %v749_v25  ;;  %v934_v14 = vadd.f32 0.5, %v902_v12  ;;  %2328 = vtanh.f32 %v851_v20  ;;  %v164_v5 = vld [vmem:[#allocation3 + $0x2f0] sm:$0xff] }
  0xba   :  { %v2084_v35 = vpack.c.bf16 %v1000_v23, %v996_v17  ;;  %v2311_v38 = vpop.eup %2310  ;;  %v938_v42 = vadd.f32 0.5, %v906_v59  ;;  %v620_v24 = vadd.f32 %v524_v26, %v254_v31  ;;  %v652_v43 = vmul.f32 0.5, %v556_v32  ;;  %v256_v63 = vld [vmem:[#allocation6 + $0x2d0] sm:$0xff] }
  0xbb   :  { %v753_v39 = vadd.f32 0.5, %v721_v28  ;;  %v2313_v41 = vpop.eup %2312  ;;  %2330 = vtanh.f32 %v813_v36  ;;  %v624_v46 = vadd.f32 %v528_v27, %v258_v37  ;;  %v656_v48 = vmul.f32 0.5, %v560_v33  ;;  %v224_v23 = vld [vmem:[#allocation6 + $0x1d0] sm:$0xff] }
  0xbc   :  { %2085 = vmatpush1.bf16.msra.mxu0 %v2084_v35  ;;  %v2315_v44 = vpop.eup %2314  ;;  %2332 = vtanh.f32 %v588_v18  ;;  %v909_v50 = vmul.f32 0.5, %v2311_v38  ;;  %v592_v51 = vadd.f32 %v496_v6, %v226_v40  ;;  %v462_v57 = vmul.f32 %v2842_v30, %v96_v29  ;;  %v228_v25 = vld [vmem:[#allocation6 + $0x1f0] sm:$0xff] }
  0xbd   :  { %v817_v45 = vmul.f32 %v2309_v34, %v753_v39  ;;  %v2317_v49 = vpop.eup %2316  ;;  %2334 = vtanh.f32 %v652_v43  ;;  %v466_v58 = vmul.f32 %v2842_v30, %v100_v19  ;;  %v913_v47 = vmul.f32 0.5, %v2313_v41  ;;  %v260_v27 = vld [vmem:[#allocation6 + $0x2f0] sm:$0xff] }
  0xbe   :  { %v2319_v16 = vpop.eup %2318  ;;  %v719_v54 = vmul.f32 0.5, %v2317_v49  ;;  %v844_v12 = vmul.f32 0.5, %v620_v24  ;;  %v848_v53 = vmul.f32 0.5, %v624_v46  ;;  %v494_v7 = vmul.f32 %v2842_v30, %v128_v52 }
  0xbf   :  { %2336 = vtanh.f32 %v817_v45  ;;  %v2321_v60 = vpop.eup %2320  ;;  %v998_v61 = vmul.f32 %v2319_v16, %v934_v14  ;;  %v526_v10 = vmul.f32 %v2842_v30, %v160_v55  ;;  %v558_v13 = vadd.f32 %v462_v57, %v192_v56 }
  0xc0   :  { %2338 = vtanh.f32 %v656_v48  ;;  %v2323_v3 = vpop.eup %2322  ;;  %v1002_v59 = vmul.f32 %v2321_v60, %v938_v42  ;;  %v751_v4 = vadd.f32 0.5, %v719_v54  ;;  %v498_v17 = vmul.f32 %v2842_v30, %v132_v62 }
  0xc1   :  { %v2325_v8 = vpop.eup %2324  ;;  %v723_v9 = vmul.f32 0.5, %v2323_v3  ;;  %2340 = vtanh.f32 %v592_v51  ;;  %v562_v20 = vadd.f32 %v466_v58, %v196_v2  ;;  %v941_v6 = vadd.f32 0.5, %v909_v50 }
  0xc2   :  { %v2100_v11 = vpack.c.bf16 %v1002_v59, %v998_v61  ;;  %v815_v15 = vmul.f32 %v2315_v44, %v751_v4  ;;  %v2327_v21 = vpop.eup %2326  ;;  %2342 = vtanh.f32 %v844_v12  ;;  %v530_v26 = vmul.f32 %v2842_v30, %v164_v5 }
  0xc3   :  { %v755_v22 = vadd.f32 0.5, %v723_v9  ;;  %v2329_v28 = vpop.eup %2328  ;;  %v945_v31 = vadd.f32 0.5, %v913_v47  ;;  %v622_v34 = vadd.f32 %v526_v10, %v256_v63  ;;  %v654_v35 = vmul.f32 0.5, %v558_v13 }
  0xc4   :  { %2101 = vmatpush1.bf16.msra.mxu1 %v2100_v11  ;;  %2344 = vtanh.f32 %v815_v15  ;;  %v658_v36 = vmul.f32 0.5, %v562_v20  ;;  %v590_v18 = vadd.f32 %v494_v7, %v224_v23  ;;  %v594_v38 = vadd.f32 %v498_v17, %v228_v25 }
  0xc5   :  { %v2331_v32 = vpop.eup %2330  ;;  %v819_v33 = vmul.f32 %v2325_v8, %v755_v22  ;;  %2346 = vtanh.f32 %v848_v53  ;;  %v626_v40 = vadd.f32 %v530_v26, %v260_v27  ;;  %v911_v30 = vmul.f32 0.5, %v2327_v21 }
  0xc6   :  { %v2333_v37 = vpop.eup %2332  ;;  %v1005_v39 = vmul.f32 %v2331_v32, %v941_v6  ;;  %v2725_v24 = vmov 0.0   ;;  %v846_v19 = vmul.f32 0.5, %v622_v34  ;;  %v915_v44 = vmul.f32 0.5, %v2329_v28  ;;  %v262_v28 = vld [vmem:[%s3728_s3] sm:$0xff] }
  0xc7   :  { %v2335_v14 = vpop.eup %2334  ;;  %2348 = vtanh.f32 %v819_v33  ;;  %1149 = vmatprep.mubr.f32.mxu0 %v2725_v24  ;;  %1358 = vmatprep.mubr.f32.mxu1 %v2725_v24  ;;  %v850_v50 = vmul.f32 0.5, %v626_v40  ;;  %v943_v51 = vadd.f32 0.5, %v911_v30  ;;  %v263_v33 = vld [vmem:[%s3728_s3 + $0x8] sm:$0xff]  ;;  %v268_v40 = vld [vmem:[%s3728_s3 + $0x30] sm:$0xff]  ;;  %v270_v30 = vld [vmem:[%s3728_s3 + $0x40] sm:$0xff] }
  0xc8   :  { %v716_v42 = vmul.f32 0.5, %v2335_v14  ;;  %2350 = vtanh.f32 %v654_v35  ;;  %v947_v56 = vadd.f32 0.5, %v915_v44  ;;  %v266_v14 = vld [vmem:[%s3728_s3 + $0x20] sm:$0xff]  ;;  %v275_v44 = vld [vmem:[%s3728_s3 + $0x68] sm:$0xff] }
  0xc9   :  { %v2337_v41 = vpop.eup %2336  ;;  %2352 = vtanh.f32 %v658_v36 }
  0xca   :  { %v2339_v43 = vpop.eup %2338  ;;  %v1009_v29 = vmul.f32 %v2337_v41, %v945_v31  ;;  %v748_v46 = vadd.f32 0.5, %v716_v42  ;;  %2354 = vtanh.f32 %v590_v18  ;;  %v264_v18 = vld [vmem:[%s3728_s3 + $0x10] sm:$0xff]  ;;  %v269_v41 = vld [vmem:[%s3728_s3 + $0x38] sm:$0xff]  ;;  %v271_v42 = vld [vmem:[%s3728_s3 + $0x48] sm:$0xff] }
  0xcb   :  { %v720_v45 = vmul.f32 0.5, %v2339_v43  ;;  %v2341_v48 = vpop.eup %2340  ;;  %2356 = vtanh.f32 %v594_v38  ;;  %v265_v38 = vld [vmem:[%s3728_s3 + $0x18] sm:$0xff]  ;;  %v272_v43 = vld [vmem:[%s3728_s3 + $0x50] sm:$0xff] }
  0xcc   :  { %v2086_v49 = vpack.c.bf16 %v1009_v29, %v1005_v39  ;;  %v812_v16 = vmul.f32 %v2333_v37, %v748_v46  ;;  %v2343_v54 = vpop.eup %2342  ;;  %2358 = vtanh.f32 %v846_v19  ;;  %v267_v39 = vld [vmem:[%s3728_s3 + $0x28] sm:$0xff]  ;;  %v273_v29 = vld [vmem:[%s3728_s3 + $0x58] sm:$0xff]  ;;  %v274_v19 = vld [vmem:[%s3728_s3 + $0x60] sm:$0xff] }
  0xcd   :  { %v752_v52 = vadd.f32 0.5, %v720_v45  ;;  %v908_v47 = vmul.f32 0.5, %v2343_v54  ;;  %v276_v45 = vld [vmem:[%s3728_s3 + $0x70] sm:$0xff]  ;;  %v277_v46 = vld [vmem:[%s3728_s3 + $0x78] sm:$0xff] }
  0xce   :  { %2087 = vmatprep.subr.bf16.mxu0 %v2086_v49  ;;  %v2345_v55 = vpop.eup %2344  ;;  %2360 = vtanh.f32 %v812_v16  ;;  %v279_v49 = vld [vmem:[%s3728_s3 + $0x88] sm:$0xff]  ;;  %v284_v54 = vld [vmem:[%s3728_s3 + $0xb0] sm:$0xff] }
  0xcf   :  { %v816_v57 = vmul.f32 %v2341_v48, %v752_v52  ;;  %2362 = vtanh.f32 %v850_v50  ;;  %v2347_v58 = vpop.eup %2346  ;;  %v1007_v60 = vmul.f32 %v2345_v55, %v943_v51  ;;  %v940_v8 = vadd.f32 0.5, %v908_v47  ;;  %v278_v48 = vld [vmem:[%s3728_s3 + $0x80] sm:$0xff]  ;;  %v280_v50 = vld [vmem:[%s3728_s3 + $0x90] sm:$0xff]  ;;  %v281_v51 = vld [vmem:[%s3728_s3 + $0x98] sm:$0xff] }
  0xd0   :  { %v912_v3 = vmul.f32 0.5, %v2347_v58  ;;  %v282_v52 = vld [vmem:[%s3728_s3 + $0xa0] sm:$0xff]  ;;  %v283_v16 = vld [vmem:[%s3728_s3 + $0xa8] sm:$0xff]  ;;  %v285_v55 = vld [vmem:[%s3728_s3 + $0xb8] sm:$0xff] }
  0xd1   :  { %2364 = vtanh.f32 %v816_v57  ;;  %v2349_v61 = vpop.eup %2348 }
  0xd2   :  { %v2351_v12 = vpop.eup %2350  ;;  %v1011_v62 = vmul.f32 %v2349_v61, %v947_v56  ;;  %v944_v11 = vadd.f32 0.5, %v912_v3  ;;  %v286_v61 = vld [vmem:[#allocation8] sm:$0xff] }
  0xd3   :  { %v2353_v2 = vpop.eup %2352  ;;  %v718_v59 = vmul.f32 0.5, %v2351_v12  ;;  %v287_v12 = vld [vmem:[#allocation8 + $0x8] sm:$0xff]  ;;  %v290_v3 = vld [vmem:[#allocation8 + $0x20] sm:$0xff] }
  0xd4   :  { %v2355_v4 = vpop.eup %2354  ;;  %v2102_v53 = vpack.c.bf16 %v1011_v62, %v1007_v60  ;;  %v722_v5 = vmul.f32 0.5, %v2353_v2 }
  0xd5   :  { %v2357_v7 = vpop.eup %2356  ;;  %v750_v9 = vadd.f32 0.5, %v718_v59 }
  0xd6   :  { %2103 = vmatprep.subr.bf16.mxu1 %v2102_v53  ;;  %v754_v10 = vadd.f32 0.5, %v722_v5  ;;  %v2359_v13 = vpop.eup %2358  ;;  %v291_v53 = vld [vmem:[#allocation8 + $0x28] sm:$0xff] }
  0xd7   :  { %v814_v15 = vmul.f32 %v2355_v4, %v750_v9  ;;  %v910_v23 = vmul.f32 0.5, %v2359_v13  ;;  %v288_v13 = vld [vmem:[#allocation8 + $0x10] sm:$0xff] }
  0xd8   :  { %v2361_v63 = vpop.eup %2360  ;;  %v818_v17 = vmul.f32 %v2357_v7, %v754_v10  ;;  %v294_v7 = vld [vmem:[#allocation8 + $0x40] sm:$0xff] }
  0xd9   :  { %v2363_v20 = vpop.eup %2362  ;;  %v1004_v21 = vmul.f32 %v2361_v63, %v940_v8  ;;  %2366 = vtanh.f32 %v814_v15  ;;  %v942_v31 = vadd.f32 0.5, %v910_v23  ;;  %v298_v23 = vld [vmem:[#allocation8 + $0x60] sm:$0xff] }
  0xda   :  { %2368 = vtanh.f32 %v818_v17  ;;  %v914_v26 = vmul.f32 0.5, %v2363_v20  ;;  %v289_v17 = vld [vmem:[#allocation8 + $0x18] sm:$0xff] }
  0xdb   :  { %v2365_v6 = vpop.eup %2364 }
  0xdc   :  { %v1008_v22 = vmul.f32 %v2365_v6, %v944_v11  ;;  %v946_v27 = vadd.f32 0.5, %v914_v26 }
  0xde   :  { %v2088_v25 = vpack.c.bf16 %v1008_v22, %v1004_v21 }
  0xe0   :  { %2089 = vmatpush1.bf16.msra.mxu0 %v2088_v25 }
  0xe3   :  { %2026 = vmatmul.mubr.msk.f32.vlgmr.msra.gmra.mrb[0].mxu0 %vm1012_vm0, %v262_v28  ;;  %v2367_v32 = vpop.eup %2366 }
  0xe4   :  { %1155 = vmatprep.mubr.f32.mxu0 %v2725_v24  ;;  %v2369_v34 = vpop.eup %2368  ;;  %v1006_v35 = vmul.f32 %v2367_v32, %v942_v31  ;;  %v299_v31 = vld [vmem:[#allocation8 + $0x68] sm:$0xff] }
  0xe5   :  { %v1010_v36 = vmul.f32 %v2369_v34, %v946_v27 }
  0xe7   :  { %2027 = vmatmul.mubr.msk.f32.gmra.mrb[2].mxu0 %vm1012_vm0, %v263_v33  ;;  %v2104_v37 = vpack.c.bf16 %v1010_v36, %v1006_v35  ;;  %v293_v36 = vld [vmem:[#allocation8 + $0x38] sm:$0xff] }
  0xe8   :  { %1161 = vmatprep.mubr.f32.mxu0 %v2725_v24 }
  0xe9   :  { %2105 = vmatpush1.bf16.msra.mxu1 %v2104_v37 }
  0xeb   :  { %2028 = vmatmul.mubr.msk.f32.gmra.mrb[4].mxu0 %vm1012_vm0, %v264_v18 }
  0xec   :  { %1167 = vmatprep.mubr.f32.mxu0 %v2725_v24  ;;  %2050 = vmatmul.mubr.msk.f32.vlgmr.msra.gmra.mrb[0].mxu1 %vm1012_vm0, %v262_v28 }
  0xed   :  { %1364 = vmatprep.mubr.f32.mxu1 %v2725_v24 }
  0xef   :  { %2029 = vmatmul.mubr.msk.f32.gmra.mrb[6].mxu0 %vm1012_vm0, %v265_v38 }
  0xf0   :  { %1173 = vmatprep.mubr.f32.mxu0 %v2725_v24  ;;  %2051 = vmatmul.mubr.msk.f32.gmra.mrb[2].mxu1 %vm1012_vm0, %v263_v33  ;;  %v292_v33 = vld [vmem:[#allocation8 + $0x30] sm:$0xff] }
  0xf1   :  { %1370 = vmatprep.mubr.f32.mxu1 %v2725_v24 }
  0xf3   :  { %2030 = vmatmul.mubr.msk.f32.gmra.mrb[8].mxu0 %vm1012_vm0, %v266_v14 }
  0xf4   :  { %1179 = vmatprep.mubr.f32.mxu0 %v2725_v24  ;;  %2052 = vmatmul.mubr.msk.f32.gmra.mrb[4].mxu1 %vm1012_vm0, %v264_v18 }
  0xf5   :  { %1376 = vmatprep.mubr.f32.mxu1 %v2725_v24 }
  0xf7   :  { %2031 = vmatmul.mubr.msk.f32.gmra.mrb[10].mxu0 %vm1012_vm0, %v267_v39 }
  0xf8   :  { %1185 = vmatprep.mubr.f32.mxu0 %v2725_v24  ;;  %2053 = vmatmul.mubr.msk.f32.gmra.mrb[6].mxu1 %vm1012_vm0, %v265_v38 }
  0xf9   :  { %1382 = vmatprep.mubr.f32.mxu1 %v2725_v24 }
  0xfb   :  { %2032 = vmatmul.mubr.msk.f32.gmra.mrb[12].mxu0 %vm1012_vm0, %v268_v40 }
  0xfc   :  { %1191 = vmatprep.mubr.f32.mxu0 %v2725_v24  ;;  %2054 = vmatmul.mubr.msk.f32.gmra.mrb[8].mxu1 %vm1012_vm0, %v266_v14 }
  0xfd   :  { %1388 = vmatprep.mubr.f32.mxu1 %v2725_v24 }
  0xff   :  { %2033 = vmatmul.mubr.msk.f32.gmra.mrb[14].mxu0 %vm1012_vm0, %v269_v41 }
 0x100   :  { %1197 = vmatprep.mubr.f32.mxu0 %v2725_v24  ;;  %2055 = vmatmul.mubr.msk.f32.gmra.mrb[10].mxu1 %vm1012_vm0, %v267_v39 }
 0x101   :  { %1394 = vmatprep.mubr.f32.mxu1 %v2725_v24 }
 0x103   :  { %2034 = vmatmul.mubr.msk.f32.gmra.mrb[16].mxu0 %vm1012_vm0, %v270_v30 }
 0x104   :  { %1203 = vmatprep.mubr.f32.mxu0 %v2725_v24  ;;  %2056 = vmatmul.mubr.msk.f32.gmra.mrb[12].mxu1 %vm1012_vm0, %v268_v40  ;;  %v302_v40 = vld [vmem:[#allocation8 + $0x80] sm:$0xff] }
 0x105   :  { %1400 = vmatprep.mubr.f32.mxu1 %v2725_v24 }
 0x107   :  { %2035 = vmatmul.mubr.msk.f32.gmra.mrb[18].mxu0 %vm1012_vm0, %v271_v42 }
 0x108   :  { %1209 = vmatprep.mubr.f32.mxu0 %v2725_v24  ;;  %2057 = vmatmul.mubr.msk.f32.gmra.mrb[14].mxu1 %vm1012_vm0, %v269_v41 }
 0x109   :  { %1406 = vmatprep.mubr.f32.mxu1 %v2725_v24 }
 0x10b   :  { %2036 = vmatmul.mubr.msk.f32.gmra.mrb[20].mxu0 %vm1012_vm0, %v272_v43 }
 0x10c   :  { %1215 = vmatprep.mubr.f32.mxu0 %v2725_v24  ;;  %2058 = vmatmul.mubr.msk.f32.gmra.mrb[16].mxu1 %vm1012_vm0, %v270_v30 }
 0x10d   :  { %1412 = vmatprep.mubr.f32.mxu1 %v2725_v24 }
 0x10f   :  { %2037 = vmatmul.mubr.msk.f32.gmra.mrb[22].mxu0 %vm1012_vm0, %v273_v29 }
 0x110   :  { %1221 = vmatprep.mubr.f32.mxu0 %v2725_v24  ;;  %2059 = vmatmul.mubr.msk.f32.gmra.mrb[18].mxu1 %vm1012_vm0, %v271_v42 }
 0x111   :  { %1418 = vmatprep.mubr.f32.mxu1 %v2725_v24 }
 0x113   :  { %2038 = vmatmul.mubr.msk.f32.gmra.mrb[24].mxu0 %vm1012_vm0, %v274_v19 }
 0x114   :  { %1227 = vmatprep.mubr.f32.mxu0 %v2725_v24  ;;  %2060 = vmatmul.mubr.msk.f32.gmra.mrb[20].mxu1 %vm1012_vm0, %v272_v43  ;;  %v303_v43 = vld [vmem:[#allocation8 + $0x88] sm:$0xff] }
 0x115   :  { %1424 = vmatprep.mubr.f32.mxu1 %v2725_v24 }
 0x117   :  { %2039 = vmatmul.mubr.msk.f32.gmra.mrb[26].mxu0 %vm1012_vm0, %v275_v44 }
 0x118   :  { %1233 = vmatprep.mubr.f32.mxu0 %v2725_v24  ;;  %2061 = vmatmul.mubr.msk.f32.gmra.mrb[22].mxu1 %vm1012_vm0, %v273_v29 }
 0x119   :  { %1430 = vmatprep.mubr.f32.mxu1 %v2725_v24 }
 0x11b   :  { %2040 = vmatmul.mubr.msk.f32.gmra.mrb[28].mxu0 %vm1012_vm0, %v276_v45 }
 0x11c   :  { %1239 = vmatprep.mubr.f32.mxu0 %v2725_v24  ;;  %2062 = vmatmul.mubr.msk.f32.gmra.mrb[24].mxu1 %vm1012_vm0, %v274_v19 }
 0x11d   :  { %1436 = vmatprep.mubr.f32.mxu1 %v2725_v24 }
 0x11f   :  { %2041 = vmatmul.mubr.msk.f32.gmra.mrb[30].mxu0 %vm1012_vm0, %v277_v46 }
 0x120   :  { %1245 = vmatprep.mubr.f32.mxu0 %v2725_v24  ;;  %2063 = vmatmul.mubr.msk.f32.gmra.mrb[26].mxu1 %vm1012_vm0, %v275_v44 }
 0x121   :  { %1442 = vmatprep.mubr.f32.mxu1 %v2725_v24 }
 0x123   :  { %2042 = vmatmul.mubr.msk.f32.gmra.mrb[32].mxu0 %vm1012_vm0, %v278_v48 }
 0x124   :  { %1251 = vmatprep.mubr.f32.mxu0 %v2725_v24  ;;  %2064 = vmatmul.mubr.msk.f32.gmra.mrb[28].mxu1 %vm1012_vm0, %v276_v45  ;;  %v296_v45 = vld [vmem:[#allocation8 + $0x50] sm:$0xff] }
 0x125   :  { %1448 = vmatprep.mubr.f32.mxu1 %v2725_v24 }
 0x127   :  { %2043 = vmatmul.mubr.msk.f32.gmra.mrb[34].mxu0 %vm1012_vm0, %v279_v49 }
 0x128   :  { %1257 = vmatprep.mubr.f32.mxu0 %v2725_v24  ;;  %2065 = vmatmul.mubr.msk.f32.gmra.mrb[30].mxu1 %vm1012_vm0, %v277_v46 }
 0x129   :  { %1454 = vmatprep.mubr.f32.mxu1 %v2725_v24 }
 0x12b   :  { %2044 = vmatmul.mubr.msk.f32.gmra.mrb[36].mxu0 %vm1012_vm0, %v280_v50 }
 0x12c   :  { %1263 = vmatprep.mubr.f32.mxu0 %v2725_v24  ;;  %2066 = vmatmul.mubr.msk.f32.gmra.mrb[32].mxu1 %vm1012_vm0, %v278_v48  ;;  %v297_v48 = vld [vmem:[#allocation8 + $0x58] sm:$0xff] }
 0x12d   :  { %1460 = vmatprep.mubr.f32.mxu1 %v2725_v24 }
 0x12f   :  { %2045 = vmatmul.mubr.msk.f32.gmra.mrb[38].mxu0 %vm1012_vm0, %v281_v51 }
 0x130   :  { %1269 = vmatprep.mubr.f32.mxu0 %v2725_v24  ;;  %2067 = vmatmul.mubr.msk.f32.gmra.mrb[34].mxu1 %vm1012_vm0, %v279_v49 }
 0x131   :  { %1466 = vmatprep.mubr.f32.mxu1 %v2725_v24 }
 0x133   :  { %2046 = vmatmul.mubr.msk.f32.gmra.mrb[40].mxu0 %vm1012_vm0, %v282_v52 }
 0x134   :  { %1275 = vmatprep.mubr.f32.mxu0 %v2725_v24  ;;  %2068 = vmatmul.mubr.msk.f32.gmra.mrb[36].mxu1 %vm1012_vm0, %v280_v50 }
 0x135   :  { %1472 = vmatprep.mubr.f32.mxu1 %v2725_v24 }
 0x137   :  { %2047 = vmatmul.mubr.msk.f32.gmra.mrb[42].mxu0 %vm1012_vm0, %v283_v16 }
 0x138   :  { %1281 = vmatprep.mubr.f32.mxu0 %v2725_v24  ;;  %2069 = vmatmul.mubr.msk.f32.gmra.mrb[38].mxu1 %vm1012_vm0, %v281_v51 }
 0x139   :  { %1478 = vmatprep.mubr.f32.mxu1 %v2725_v24 }
 0x13b   :  { %2048 = vmatmul.mubr.msk.f32.gmra.mrb[44].mxu0 %vm1012_vm0, %v284_v54 }
 0x13c   :  { %1287 = vmatprep.mubr.f32.mxu0 %v2725_v24  ;;  %2070 = vmatmul.mubr.msk.f32.gmra.mrb[40].mxu1 %vm1012_vm0, %v282_v52 }
 0x13d   :  { %1484 = vmatprep.mubr.f32.mxu1 %v2725_v24 }
 0x13f   :  { %2049 = vmatmul.mubr.msk.f32.gmra.mrb[46].mxu0 %vm1012_vm0, %v285_v55 }
 0x140   :  { %2071 = vmatmul.mubr.msk.f32.gmra.mrb[42].mxu1 %vm1012_vm0, %v283_v16 }
 0x141   :  { %1490 = vmatprep.mubr.f32.mxu1 %v2725_v24 }
 0x144   :  { %2072 = vmatmul.mubr.msk.f32.gmra.mrb[44].mxu1 %vm1012_vm0, %v284_v54  ;;  %v306_v54 = vld [vmem:[#allocation8 + $0xa0] sm:$0xff] }
 0x145   :  { %1496 = vmatprep.mubr.f32.mxu1 %v2725_v24  ;;  %v295_v24 = vld [vmem:[#allocation8 + $0x48] sm:$0xff] }
 0x148   :  { %2073 = vmatmul.mubr.msk.f32.gmra.mrb[46].mxu1 %vm1012_vm0, %v285_v55 }
 0x1b6   :  { %v1151_v56 = vpop.f32.mrb[0].mxu0 }
 0x1b7   :  { %v1153_v57 = vpop.f32.mrb[1].mxu0  ;;  %v1152_v59 = vadd.f32 %v1151_v56, %v286_v61 }
 0x1b8   :  { %v1154_v5 = vadd.f32 %v1153_v57, %v287_v12  ;;  %v300_v12 = vld [vmem:[#allocation8 + $0x70] sm:$0xff] }
 0x1b9   :  { %v1503_v63 = vmul.f32 0.5, %v1152_v59 }
 0x1ba   :  { %v1157_v58 = vpop.f32.mrb[2].mxu0  ;;  %v1504_v6 = vmul.f32 0.5, %v1154_v5 }
 0x1bb   :  { %v1159_v60 = vpop.f32.mrb[3].mxu0  ;;  %v1158_v9 = vadd.f32 %v1157_v58, %v290_v3  ;;  %2370 = vtanh.f32 %v1503_v63  ;;  %v307_v58 = vld [vmem:[#allocation8 + $0xa8] sm:$0xff] }
 0x1bc   :  { %v1160_v15 = vadd.f32 %v1159_v60, %v291_v53  ;;  %2372 = vtanh.f32 %v1504_v6  ;;  %v304_v53 = vld [vmem:[#allocation8 + $0x90] sm:$0xff] }
 0x1bd   :  { %v1507_v28 = vmul.f32 0.5, %v1158_v9 }
 0x1be   :  { %v1163_v47 = vpop.f32.mrb[4].mxu0  ;;  %v1508_v34 = vmul.f32 0.5, %v1160_v15 }
 0x1bf   :  { %v1165_v62 = vpop.f32.mrb[5].mxu0  ;;  %v1360_v2 = vpop.f32.mrb[0].mxu1  ;;  %v1164_v21 = vadd.f32 %v1163_v47, %v294_v7  ;;  %2374 = vtanh.f32 %v1507_v28 }
 0x1c0   :  { %v1362_v4 = vpop.f32.mrb[1].mxu1  ;;  %v1166_v22 = vadd.f32 %v1165_v62, %v295_v24  ;;  %v1361_v26 = vadd.f32 %v1360_v2, %v288_v13  ;;  %2376 = vtanh.f32 %v1508_v34  ;;  %v301_v2 = vld [vmem:[#allocation8 + $0x78] sm:$0xff] }
 0x1c1   :  { %v1363_v32 = vadd.f32 %v1362_v4, %v289_v17  ;;  %v1511_v37 = vmul.f32 0.5, %v1164_v21  ;;  %v305_v13 = vld [vmem:[#allocation8 + $0x98] sm:$0xff]  ;;  %v310_v21 = vld [vmem:[#allocation8 + $0xc0] sm:$0xff] }
 0x1c2   :  { %v1169_v8 = vpop.f32.mrb[6].mxu0  ;;  %v1512_v14 = vmul.f32 0.5, %v1166_v22  ;;  %v1505_v30 = vmul.f32 0.5, %v1361_v26 }
 0x1c3   :  { %v1171_v10 = vpop.f32.mrb[7].mxu0  ;;  %v1366_v11 = vpop.f32.mrb[2].mxu1  ;;  %v1170_v38 = vadd.f32 %v1169_v8, %v298_v23  ;;  %v1506_v19 = vmul.f32 0.5, %v1363_v32  ;;  %2378 = vtanh.f32 %v1511_v37  ;;  %v309_v32 = vld [vmem:[#allocation8 + $0xb8] sm:$0xff]  ;;  %v311_v37 = vld [vmem:[#allocation8 + $0xc8] sm:$0xff] }
 0x1c4   :  { %v1368_v20 = vpop.f32.mrb[3].mxu1  ;;  %v1172_v39 = vadd.f32 %v1171_v10, %v299_v31  ;;  %v1367_v42 = vadd.f32 %v1366_v11, %v292_v33  ;;  %2380 = vtanh.f32 %v1512_v14 }
 0x1c5   :  { %v1369_v44 = vadd.f32 %v1368_v20, %v293_v36  ;;  %v1515_v49 = vmul.f32 0.5, %v1170_v38  ;;  %2382 = vtanh.f32 %v1505_v30  ;;  %v3122_v9 = vpop.eup %2370 }
 0x1c6   :  { %v1175_v25 = vpop.f32.mrb[8].mxu0  ;;  %v1516_v52 = vmul.f32 0.5, %v1172_v39  ;;  %v1509_v56 = vmul.f32 0.5, %v1367_v42  ;;  %2384 = vtanh.f32 %v1506_v19  ;;  %v3126_v15 = vpop.eup %2372 }
 0x1c7   :  { %v1177_v27 = vpop.f32.mrb[9].mxu0  ;;  %v1372_v35 = vpop.f32.mrb[4].mxu1  ;;  %v1176_v51 = vadd.f32 %v1175_v25, %v302_v40  ;;  %v1510_v61 = vmul.f32 0.5, %v1369_v44  ;;  %2386 = vtanh.f32 %v1515_v49  ;;  %v308_v25 = vld [vmem:[#allocation8 + $0xb0] sm:$0xff] }
 0x1c8   :  { %v1374_v18 = vpop.f32.mrb[5].mxu1  ;;  %v1178_v16 = vadd.f32 %v1177_v27, %v303_v43  ;;  %v1373_v57 = vadd.f32 %v1372_v35, %v296_v45  ;;  %2388 = vtanh.f32 %v1516_v52  ;;  %v312_v40 = vld [vmem:[#allocation8 + $0xd0] sm:$0xff] }
 0x1c9   :  { %v1375_v47 = vadd.f32 %v1374_v18, %v297_v48  ;;  %v1519_v3 = vmul.f32 0.5, %v1176_v51  ;;  %2390 = vtanh.f32 %v1509_v56  ;;  %v3128_v6 = vpop.eup %2374 }
 0x1ca   :  { %v1181_v41 = vpop.f32.mrb[10].mxu0  ;;  %v1520_v5 = vmul.f32 0.5, %v1178_v16  ;;  %v1513_v24 = vmul.f32 0.5, %v1373_v57  ;;  %2392 = vtanh.f32 %v1510_v61  ;;  %v3130_v28 = vpop.eup %2376 }
 0x1cb   :  { %v1183_v29 = vpop.f32.mrb[11].mxu0  ;;  %v1378_v46 = vpop.f32.mrb[6].mxu1  ;;  %v1182_v4 = vadd.f32 %v1181_v41, %v306_v54  ;;  %v1514_v63 = vmul.f32 0.5, %v1375_v47  ;;  %2394 = vtanh.f32 %v1519_v3  ;;  %v320_v47 = vld [vmem:[#allocation8 + $0x110] sm:$0xff]  ;;  %v319_v3 = vld [vmem:[#allocation8 + $0x108] sm:$0xff] }
 0x1cc   :  { %v1380_v50 = vpop.f32.mrb[7].mxu1  ;;  %v1184_v7 = vadd.f32 %v1183_v29, %v307_v58  ;;  %v1379_v10 = vadd.f32 %v1378_v46, %v300_v12  ;;  %2396 = vtanh.f32 %v1520_v5  ;;  %v318_v58 = vld [vmem:[#allocation8 + $0x100] sm:$0xff] }
 0x1cd   :  { %v1381_v17 = vadd.f32 %v1380_v50, %v301_v2  ;;  %v1523_v23 = vmul.f32 0.5, %v1182_v4  ;;  %v3132_v34 = vpop.eup %2378  ;;  %2398 = vtanh.f32 %v1513_v24 }
 0x1ce   :  { %v1187_v55 = vpop.f32.mrb[12].mxu0  ;;  %v1524_v27 = vmul.f32 0.5, %v1184_v7  ;;  %v1517_v35 = vmul.f32 0.5, %v1379_v10  ;;  %v3134_v38 = vpop.eup %2380  ;;  %2400 = vtanh.f32 %v1514_v63  ;;  %v321_v7 = vld [vmem:[#allocation8 + $0x118] sm:$0xff]  ;;  %v322_v63 = vld [vmem:[#allocation8 + $0x120] sm:$0xff] }
 0x1cf   :  { %v1189_v60 = vpop.f32.mrb[13].mxu0  ;;  %v1384_v62 = vpop.f32.mrb[8].mxu1  ;;  %v1188_v36 = vadd.f32 %v1187_v55, %v310_v21  ;;  %v1518_v14 = vmul.f32 0.5, %v1381_v17  ;;  %2402 = vtanh.f32 %v1523_v23  ;;  %v324_v21 = vld [vmem:[#allocation8 + $0x130] sm:$0xff] }
 0x1d0   :  { %v1386_v59 = vpop.f32.mrb[9].mxu1  ;;  %v1385_v22 = vadd.f32 %v1384_v62, %v304_v53  ;;  %v3136_v30 = vpop.eup %2382  ;;  %2404 = vtanh.f32 %v1524_v27  ;;  %v1190_v45 = vadd.f32 %v1189_v60, %v311_v37  ;;  %v325_v37 = vld [vmem:[#allocation8 + $0x138] sm:$0xff] }
 0x1d1   :  { %v1387_v31 = vadd.f32 %v1386_v59, %v305_v13  ;;  %v3140_v19 = vpop.eup %2384  ;;  %2406 = vtanh.f32 %v1517_v35  ;;  %v1527_v49 = vmul.f32 0.5, %v1188_v36 }
 0x1d2   :  { %v3120_v8 = vpop.f32.mrb[14].mxu0  ;;  %v1521_v42 = vmul.f32 0.5, %v1385_v22  ;;  %v3142_v48 = vpop.eup %2386  ;;  %2408 = vtanh.f32 %v1518_v14  ;;  %v1528_v61 = vmul.f32 0.5, %v1190_v45 }
 0x1d3   :  { %v3124_v11 = vpop.f32.mrb[15].mxu0  ;;  %v1390_v20 = vpop.f32.mrb[10].mxu1  ;;  %v1522_v44 = vmul.f32 0.5, %v1387_v31 }
 0x1d4   :  { %v1392_v26 = vpop.f32.mrb[11].mxu1  ;;  %v1391_v39 = vadd.f32 %v1390_v20, %v308_v25  ;;  %v3144_v52 = vpop.eup %2388  ;;  %2410 = vtanh.f32 %v1521_v42  ;;  %v313_v42 = vld [vmem:[#allocation8 + $0xd8] sm:$0xff] }
 0x1d5   :  { %v1393_v43 = vadd.f32 %v1392_v26, %v309_v32  ;;  %v3148_v55 = vpop.eup %2390  ;;  %2412 = vtanh.f32 %v1522_v44  ;;  %v323_v26 = vld [vmem:[#allocation8 + $0x128] sm:$0xff]  ;;  %v1567_v32 = vmul.f32 0.5, %v3122_v9  ;;  %v328_v44 = vld [vmem:[#allocation8 + $0x150] sm:$0xff] }
 0x1d6   :  { %v1199_v33 = vpop.f32.mrb[16].mxu0  ;;  %v1525_v16 = vmul.f32 0.5, %v1391_v39  ;;  %v3152_v60 = vpop.eup %2392  ;;  %2414 = vtanh.f32 %v1527_v49  ;;  %v327_v49 = vld [vmem:[#allocation8 + $0x148] sm:$0xff] }
 0x1d7   :  { %v1201_v18 = vpop.f32.mrb[17].mxu0  ;;  %v1396_v41 = vpop.f32.mrb[12].mxu1  ;;  %v1526_v56 = vmul.f32 0.5, %v1393_v43  ;;  %v1200_v53 = vadd.f32 %v1199_v33, %v318_v58  ;;  %v1568_v33 = vmul.f32 0.5, %v3126_v15  ;;  %v314_v15 = vld [vmem:[#allocation8 + $0xe0] sm:$0xff] }
 0x1d8   :  { %v3138_v29 = vpop.f32.mrb[13].mxu1  ;;  %v1397_v50 = vadd.f32 %v1396_v41, %v312_v40  ;;  %v3154_v62 = vpop.eup %2394  ;;  %2416 = vtanh.f32 %v1525_v16  ;;  %v1202_v20 = vadd.f32 %v1201_v18, %v319_v3  ;;  %v326_v40 = vld [vmem:[#allocation8 + $0x140] sm:$0xff] }
 0x1d9   :  { %v3158_v4 = vpop.eup %2396  ;;  %2418 = vtanh.f32 %v1526_v56  ;;  %v1599_v56 = vadd.f32 0.5, %v1567_v32  ;;  %v1600_v58 = vadd.f32 0.5, %v1568_v33 }
 0x1da   :  { %v1205_v46 = vpop.f32.mrb[18].mxu0  ;;  %v1529_v2 = vmul.f32 0.5, %v1397_v50  ;;  %v3160_v24 = vpop.eup %2398  ;;  %2420 = vtanh.f32 %v1528_v61  ;;  %v316_v61 = vld [vmem:[#allocation8 + $0xf0] sm:$0xff] }
 0x1db   :  { %v1207_v51 = vpop.f32.mrb[19].mxu0  ;;  %v3146_v54 = vpop.f32.mrb[14].mxu1  ;;  %v1206_v35 = vadd.f32 %v1205_v46, %v322_v63  ;;  %v330_v63 = vld [vmem:[#allocation8 + $0x160] sm:$0xff] }
 0x1dc   :  { %v3150_v57 = vpop.f32.mrb[15].mxu1  ;;  %v3162_v17 = vpop.eup %2400  ;;  %2422 = vtanh.f32 %v1529_v2  ;;  %v1208_v43 = vadd.f32 %v1207_v51, %v323_v26  ;;  %v329_v51 = vld [vmem:[#allocation8 + $0x158] sm:$0xff]  ;;  %v1403_v33 = vadd.f32 %v3146_v54, %v316_v61 }
 0x1dd   :  { %v3166_v23 = vpop.eup %2402  ;;  %2424 = vtanh.f32 %v1200_v53  ;;  %v1571_v53 = vmul.f32 0.5, %v3128_v6 }
 0x1de   :  { %v1211_v12 = vpop.f32.mrb[20].mxu0  ;;  %v3170_v27 = vpop.eup %2404 }
 0x1df   :  { %v3156_v59 = vpop.f32.mrb[21].mxu0  ;;  %v1408_v5 = vpop.f32.mrb[16].mxu1 }
 0x1e0   :  { %v1409_v10 = vadd.f32 %v1408_v5, %v320_v47  ;;  %v1410_v13 = vpop.f32.mrb[17].mxu1  ;;  %v3174_v18 = vpop.eup %2406  ;;  %v1212_v47 = vadd.f32 %v1211_v12, %v326_v40  ;;  %v1399_v5 = vadd.f32 %v3138_v29, %v313_v42  ;;  %v317_v12 = vld [vmem:[#allocation8 + $0xf8] sm:$0xff]  ;;  %v1214_v26 = vadd.f32 %v3156_v59, %v327_v49 }
 0x1e1   :  { %v1411_v25 = vadd.f32 %v1410_v13, %v321_v7  ;;  %v3176_v41 = vpop.eup %2408  ;;  %v315_v7 = vld [vmem:[#allocation8 + $0xe8] sm:$0xff]  ;;  %v1570_v29 = vmul.f32 0.5, %v3140_v19  ;;  %v1603_v19 = vadd.f32 0.5, %v1571_v53  ;;  %v1405_v54 = vadd.f32 %v3150_v57, %v317_v12 }
 0x1e2   :  { %v3164_v22 = vpop.f32.mrb[22].mxu0  ;;  %2426 = vtanh.f32 %v1409_v10  ;;  %v3180_v9 = vpop.eup %2410  ;;  %v1530_v40 = vmul.f32 0.5, %v1399_v5  ;;  %v1533_v49 = vmul.f32 0.5, %v1403_v33  ;;  %v1574_v57 = vmul.f32 0.5, %v3152_v60 }
 0x1e3   :  { %v3168_v31 = vpop.f32.mrb[23].mxu0  ;;  %v1414_v36 = vpop.f32.mrb[18].mxu1  ;;  %2428 = vtanh.f32 %v1202_v20  ;;  %v1218_v59 = vadd.f32 %v3164_v22, %v330_v63  ;;  %v1576_v33 = vmul.f32 0.5, %v3134_v38 }
 0x1e4   :  { %v1415_v14 = vadd.f32 %v1414_v36, %v324_v21  ;;  %v1416_v39 = vpop.f32.mrb[19].mxu1  ;;  %2430 = vtanh.f32 %v1411_v25  ;;  %v3184_v16 = vpop.eup %2412  ;;  %v1569_v21 = vmul.f32 0.5, %v3136_v30  ;;  %v1194_v25 = vadd.f32 %v3120_v8, %v314_v15 }
 0x1e5   :  { %v1417_v46 = vadd.f32 %v1416_v39, %v325_v37  ;;  %2432 = vtanh.f32 %v1206_v35  ;;  %v3186_v3 = vpop.eup %2414  ;;  %v1572_v8 = vmul.f32 0.5, %v3130_v28  ;;  %v1196_v30 = vadd.f32 %v3124_v11, %v315_v7 }
 0x1e6   :  { %v3178_v45 = vpop.f32.mrb[24].mxu0  ;;  %2434 = vtanh.f32 %v1415_v14  ;;  %v3190_v20 = vpop.eup %2416  ;;  %v1573_v28 = vmul.f32 0.5, %v3148_v55  ;;  %v1531_v15 = vmul.f32 0.5, %v1194_v25  ;;  %v1575_v7 = vmul.f32 0.5, %v3132_v34 }
 0x1e7   :  { %v3182_v50 = vpop.f32.mrb[25].mxu0  ;;  %v1420_v2 = vpop.f32.mrb[20].mxu1  ;;  %2436 = vtanh.f32 %v1208_v43  ;;  %v1577_v25 = vmul.f32 0.5, %v3160_v24 }
 0x1e8   :  { %v1421_v10 = vadd.f32 %v1420_v2, %v328_v44  ;;  %v1422_v13 = vpop.f32.mrb[21].mxu1  ;;  %v3197_v6 = vpop.eup %2418  ;;  %2438 = vtanh.f32 %v1417_v46  ;;  %v1601_v44 = vadd.f32 0.5, %v1569_v21  ;;  %v1602_v46 = vadd.f32 0.5, %v1570_v29 }
 0x1e9   :  { %v1423_v35 = vadd.f32 %v1422_v13, %v329_v51  ;;  %v3203_v37 = vpop.eup %2420  ;;  %2440 = vtanh.f32 %v1212_v47  ;;  %v1532_v51 = vmul.f32 0.5, %v1196_v30  ;;  %v1605_v21 = vadd.f32 0.5, %v1573_v28 }
 0x1ea   :  { %v3195_v32 = vpop.f32.mrb[26].mxu0  ;;  %v3210_v39 = vpop.eup %2422  ;;  %2442 = vtanh.f32 %v1421_v10  ;;  %v1534_v10 = vmul.f32 0.5, %v1405_v54  ;;  %v1604_v29 = vadd.f32 0.5, %v1572_v8 }
 0x1eb   :  { %v3201_v36 = vpop.f32.mrb[27].mxu0  ;;  %v3208_v14 = vpop.f32.mrb[22].mxu1  ;;  %2444 = vtanh.f32 %v1214_v26 }
 0x1ec   :  { %v3213_v42 = vpop.f32.mrb[23].mxu1  ;;  %v2425_v43 = vpop.eup %2424  ;;  %2446 = vtanh.f32 %v1423_v35 }
 0x1ed   :  { %v2427_v22 = vpop.eup %2426  ;;  %v1663_v61 = vmul.f32 %v2425_v43, %v1599_v56  ;;  %2448 = vtanh.f32 %v1218_v59  ;;  %v1578_v59 = vmul.f32 0.5, %v3162_v17  ;;  %v1607_v43 = vadd.f32 0.5, %v1575_v7  ;;  %v331_v7 = vld [vmem:[#allocation8 + $0x168] sm:$0xff] }
 0x1ee   :  { %v3216_v11 = vpop.f32.mrb[28].mxu0  ;;  %v2429_v2 = vpop.eup %2428  ;;  %v1665_v53 = vmul.f32 %v2427_v22, %v1601_v44  ;;  %2450 = vtanh.f32 %v1530_v40  ;;  %v1579_v44 = vmul.f32 0.5, %v3142_v48  ;;  %v1608_v17 = vadd.f32 0.5, %v1576_v33 }
 0x1ef   :  { %v3218_v47 = vpop.f32.mrb[29].mxu0  ;;  %v3221_v5 = vpop.f32.mrb[24].mxu1  ;;  %v1664_v13 = vmul.f32 %v2429_v2, %v1600_v58  ;;  %2452 = vtanh.f32 %v1531_v15  ;;  %v1606_v58 = vadd.f32 0.5, %v1574_v57  ;;  %v332_v2 = vld [vmem:[#allocation8 + $0x170] sm:$0xff]  ;;  %v1610_v48 = vadd.f32 0.5, %v1578_v59 }
 0x1f0   :  { %v2431_v55 = vpop.eup %2430  ;;  %v3224_v63 = vpop.f32.mrb[25].mxu1  ;;  %2454 = vtanh.f32 %v1533_v49  ;;  %v1427_v33 = vadd.f32 %v3208_v14, %v332_v2 }
 0x1f1   :  { %v2433_v56 = vpop.eup %2432  ;;  %v1666_v12 = vmul.f32 %v2431_v55, %v1602_v46  ;;  %2456 = vtanh.f32 %v1532_v51 }
 0x1f2   :  { %v3227_v60 = vpop.f32.mrb[30].mxu0  ;;  %v2435_v26 = vpop.eup %2434  ;;  %v1667_v35 = vmul.f32 %v2433_v56, %v1603_v19  ;;  %2458 = vtanh.f32 %v1534_v10  ;;  %v1609_v19 = vadd.f32 0.5, %v1577_v25  ;;  %v1611_v56 = vadd.f32 0.5, %v1579_v44  ;;  %v333_v25 = vld [vmem:[#allocation8 + $0x178] sm:$0xff] }
 0x1f3   :  { %v3230_v34 = vpop.f32.mrb[31].mxu0  ;;  %v2437_v30 = vpop.eup %2436  ;;  %v1669_v40 = vmul.f32 %v2435_v26, %v1605_v21  ;;  %2460 = vtanh.f32 %v1663_v61 }
 0x1f4   :  { %v3233_v54 = vpop.f32.mrb[26].mxu1  ;;  %v2439_v24 = vpop.eup %2438  ;;  %v1668_v8 = vmul.f32 %v2437_v30, %v1604_v29  ;;  %2462 = vtanh.f32 %v1665_v53 }
 0x1f5   :  { %v3236_v28 = vpop.f32.mrb[27].mxu1  ;;  %v2441_v38 = vpop.eup %2440  ;;  %v1670_v15 = vmul.f32 %v2439_v24, %v1606_v58  ;;  %2464 = vtanh.f32 %v1664_v13  ;;  %v334_v13 = vld [vmem:[#allocation8 + $0x180] sm:$0xff]  ;;  %v336_v24 = vld [vmem:[#allocation8 + $0x190] sm:$0xff] }
 0x1f6   :  { %v3238_v22 = vpop.f32.mrb[32].mxu0  ;;  %v2443_v46 = vpop.eup %2442  ;;  %v3240_v49 = vmul.f32 %v2441_v38, %v1607_v43  ;;  %2466 = vtanh.f32 %v1666_v12  ;;  %v1220_v12 = vadd.f32 %v3168_v31, %v331_v7  ;;  %v335_v38 = vld [vmem:[#allocation8 + $0x188] sm:$0xff]  ;;  %v1433_v2 = vadd.f32 %v3221_v5, %v336_v24  ;;  %v340_v7 = vld [vmem:[#allocation8 + $0x1b0] sm:$0xff] }
 0x1f7   :  { %v3242_v57 = vpop.f32.mrb[33].mxu0  ;;  %v2445_v51 = vpop.eup %2444  ;;  %v3244_v55 = vmul.f32 %v2443_v46, %v1609_v19  ;;  %2468 = vtanh.f32 %v1667_v35  ;;  %v1429_v35 = vadd.f32 %v3213_v42, %v333_v25  ;;  %v337_v46 = vld [vmem:[#allocation8 + $0x198] sm:$0xff]  ;;  %v1583_v24 = vmul.f32 0.5, %v3154_v62 }
 0x1f8   :  { %v3246_v10 = vpop.f32.mrb[28].mxu1  ;;  %v2447_v61 = vpop.eup %2446  ;;  %v3248_v21 = vmul.f32 %v2445_v51, %v1608_v17  ;;  %2470 = vtanh.f32 %v1669_v40  ;;  %v1224_v40 = vadd.f32 %v3178_v45, %v334_v13  ;;  %v338_v51 = vld [vmem:[#allocation8 + $0x1a0] sm:$0xff]  ;;  %v1587_v62 = vmul.f32 0.5, %v3166_v23 }
 0x1f9   :  { %v3250_v53 = vpop.f32.mrb[29].mxu1  ;;  %v2449_v26 = vpop.eup %2448  ;;  %v3252_v29 = vmul.f32 %v2447_v61, %v1610_v48  ;;  %2472 = vtanh.f32 %v1668_v8  ;;  %v1226_v48 = vadd.f32 %v3182_v50, %v335_v38  ;;  %v1435_v61 = vadd.f32 %v3224_v63, %v337_v46 }
 0x1fa   :  { %v3255_v30 = vpop.f32.mrb[34].mxu0  ;;  %v3257_v58 = vpop.eup %2450  ;;  %v3259_v59 = vmul.f32 %v2449_v26, %v1611_v56  ;;  %2474 = vtanh.f32 %v1670_v15  ;;  %v339_v56 = vld [vmem:[#allocation8 + $0x1a8] sm:$0xff]  ;;  %v1230_v26 = vadd.f32 %v3195_v32, %v338_v51  ;;  %v1439_v63 = vadd.f32 %v3233_v54, %v340_v7 }
 0x1fb   :  { %v3262_v43 = vpop.f32.mrb[35].mxu0  ;;  %v3264_v44 = vpop.eup %2452  ;;  %2476 = vtanh.f32 %v1427_v33  ;;  %v341_v33 = vld [vmem:[#allocation8 + $0x1b8] sm:$0xff]  ;;  %v1584_v32 = vmul.f32 0.5, %v3158_v4  ;;  %v1232_v51 = vadd.f32 %v3201_v36, %v339_v56  ;;  %v1588_v54 = vmul.f32 0.5, %v3170_v27 }
 0x1fc   :  { %v3267_v14 = vpop.f32.mrb[30].mxu1  ;;  %v3269_v19 = vpop.eup %2454  ;;  %2478 = vtanh.f32 %v1220_v12  ;;  %v1580_v12 = vmul.f32 0.5, %v3144_v52  ;;  %v1582_v4 = vmul.f32 0.5, %v3176_v41  ;;  %v1585_v36 = vmul.f32 0.5, %v3180_v9 }
 0x1fd   :  { %v3272_v17 = vpop.f32.mrb[31].mxu1  ;;  %v3274_v31 = vpop.eup %2456  ;;  %2480 = vtanh.f32 %v1429_v35  ;;  %v342_v35 = vld [vmem:[#allocation8 + $0x1c0] sm:$0xff]  ;;  %v1586_v23 = vmul.f32 0.5, %v3184_v16  ;;  %v1445_v27 = vadd.f32 %v3246_v10, %v344_v0 }
 0x1fe   :  { %v3277_v8 = vpop.f32.mrb[36].mxu0  ;;  %v3279_v42 = vpop.eup %2458  ;;  %2482 = vtanh.f32 %v1224_v40  ;;  %v1581_v40 = vmul.f32 0.5, %v3174_v18  ;;  %v1612_v41 = vadd.f32 0.5, %v1580_v12  ;;  %v1614_v0 = vadd.f32 0.5, %v1582_v4 }
 0x1ff   :  { %v3282_v15 = vpop.f32.mrb[37].mxu0  ;;  %v3284_v45 = vpop.eup %2460  ;;  %2484 = vtanh.f32 %v1433_v2  ;;  %v1441_v2 = vadd.f32 %v3236_v28, %v341_v33  ;;  %v1617_v10 = vadd.f32 0.5, %v1585_v36 }
 0x200   :  { %3736 = vst [vmem:[#allocation14_spill] sm:$0xff] %v3284_v45  ;;  %v3287_v25 = vpop.f32.mrb[32].mxu1  ;;  %v3289_v5 = vpop.eup %2462  ;;  %2486 = vtanh.f32 %v1226_v48  ;;  %v1236_v48 = vadd.f32 %v3216_v11, %v342_v35  ;;  %v1613_v33 = vadd.f32 0.5, %v1581_v40  ;;  %v1619_v35 = vadd.f32 0.5, %v1587_v62 }
 0x201   :  { %3737 = vst [vmem:[#allocation15_spill] sm:$0xff] %v3289_v5  ;;  %v3292_v13 = vpop.f32.mrb[33].mxu1  ;;  %v3294_v50 = vpop.eup %2464  ;;  %2488 = vtanh.f32 %v1435_v61  ;;  %v1591_v40 = vmul.f32 0.5, %v3186_v3  ;;  %v355_v5 = vld [vmem:[#allocation8 + $0x228] sm:$0xff] }
 0x202   :  { %3738 = vst [vmem:[#allocation16_spill] sm:$0xff] %v3294_v50  ;;  %v3299_v38 = vpop.f32.mrb[38].mxu0  ;;  %v3301_v46 = vpop.eup %2466  ;;  %2490 = vtanh.f32 %v1230_v26  ;;  %v1616_v26 = vadd.f32 0.5, %v1584_v32 }
 0x203   :  { %3739 = vst [vmem:[#allocation17_spill] sm:$0xff] %v3301_v46  ;;  %v3306_v1 = vpop.f32.mrb[39].mxu0  ;;  %v3308_v52 = vpop.eup %2468  ;;  %2492 = vtanh.f32 %v1439_v63  ;;  %v3332_v46 = vadd.f32 0.5, %v1588_v54  ;;  %v1589_v54 = vmul.f32 0.5, %v3190_v20  ;;  %v1594_v20 = vmul.f32 0.5, %v3257_v58 }
 0x204   :  { %3740 = vst [vmem:[#allocation18_spill] sm:$0xff] %v3308_v52  ;;  %v3313_v7 = vpop.f32.mrb[34].mxu1  ;;  %v3315_v18 = vpop.eup %2470  ;;  %2494 = vtanh.f32 %v1232_v51 }
 0x205   :  { %3741 = vst [vmem:[#allocation19_spill] sm:$0xff] %v3315_v18  ;;  %v3320_v56 = vpop.f32.mrb[35].mxu1  ;;  %v3322_v52 = vpop.eup %2472  ;;  %v1615_v18 = vadd.f32 0.5, %v1583_v24  ;;  %2496 = vtanh.f32 %v1441_v2  ;;  %v1618_v24 = vadd.f32 0.5, %v1586_v23  ;;  %v1590_v2 = vmul.f32 0.5, %v3197_v6 }
 0x206   :  { %3742 = vst [vmem:[#allocation20_spill] sm:$0xff] %v3322_v52  ;;  %v3326_v28 = vpop.f32.mrb[40].mxu0  ;;  %v3328_v61 = vpop.eup %2474  ;;  %2498 = vtanh.f32 %v1236_v48  ;;  %v1592_v23 = vmul.f32 0.5, %v3203_v37  ;;  %v1595_v6 = vmul.f32 0.5, %v3264_v44 }
 0x207   :  { %3743 = vst [vmem:[#allocation21_spill] sm:$0xff] %v3328_v61  ;;  %v3330_v9 = vpop.f32.mrb[41].mxu0  ;;  %v2477_v11 = vpop.eup %2476  ;;  %2500 = vtanh.f32 %v1445_v27 }
 0x208   :  { %v3334_v16 = vpop.f32.mrb[36].mxu1  ;;  %v2479_v63 = vpop.eup %2478  ;;  %v1677_v52 = vmul.f32 %v2477_v11, %v1613_v33  ;;  %2502 = vtanh.f32 %v3240_v49  ;;  %v1593_v33 = vmul.f32 0.5, %v3210_v39  ;;  %v1597_v39 = vmul.f32 0.5, %v3269_v19  ;;  %v343_v19 = vld [vmem:[#allocation8 + $0x1c8] sm:$0xff] }
 0x209   :  { %v3336_v61 = vpop.f32.mrb[37].mxu1  ;;  %v2481_v12 = vpop.eup %2480  ;;  %v1676_v51 = vmul.f32 %v2479_v63, %v1612_v41  ;;  %2504 = vtanh.f32 %v3244_v55 }
 0x20a   :  { %v3339_v32 = vpop.f32.mrb[42].mxu0  ;;  %v2483_v62 = vpop.eup %2482  ;;  %v1678_v4 = vmul.f32 %v2481_v12, %v1614_v0  ;;  %2506 = vtanh.f32 %v3248_v21  ;;  %v1623_v0 = vadd.f32 0.5, %v1591_v40  ;;  %v1621_v12 = vadd.f32 0.5, %v1589_v54 }
 0x20b   :  { %v3344_v36 = vpop.f32.mrb[43].mxu0  ;;  %v2485_v48 = vpop.eup %2484  ;;  %v1679_v3 = vmul.f32 %v2483_v62, %v1615_v18  ;;  %2508 = vtanh.f32 %v3252_v29  ;;  %v1622_v62 = vadd.f32 0.5, %v1590_v2 }
 0x20c   :  { %v3349_v27 = vpop.f32.mrb[38].mxu1  ;;  %v2487_v41 = vpop.eup %2486  ;;  %v1681_v49 = vmul.f32 %v2485_v48, %v1617_v10  ;;  %2510 = vtanh.f32 %v3259_v59  ;;  %v1625_v10 = vadd.f32 0.5, %v1593_v33  ;;  %v3363_v48 = vadd.f32 0.5, %v1592_v23  ;;  %v350_v59 = vld [vmem:[#allocation8 + $0x200] sm:$0xff] }
 0x20d   :  { %v3354_v11 = vpop.f32.mrb[39].mxu1  ;;  %v2489_v63 = vpop.eup %2488  ;;  %v1680_v37 = vmul.f32 %v2487_v41, %v1616_v26  ;;  %2512 = vtanh.f32 %v1677_v52  ;;  %v3367_v26 = vadd.f32 0.5, %v1594_v20  ;;  %v3369_v41 = vadd.f32 0.5, %v1595_v6  ;;  %v345_v20 = vld [vmem:[#allocation8 + $0x1d8] sm:$0xff] }
 0x20e   :  { %v3358_v55 = vpop.f32.mrb[44].mxu0  ;;  %v2491_v18 = vpop.eup %2490  ;;  %v1682_v58 = vmul.f32 %v2489_v63, %v1618_v24  ;;  %2514 = vtanh.f32 %v1676_v51  ;;  %v351_v24 = vld [vmem:[#allocation8 + $0x208] sm:$0xff]  ;;  %v3375_v23 = vadd.f32 0.5, %v1597_v39  ;;  %v1596_v52 = vmul.f32 0.5, %v3274_v31  ;;  %v354_v63 = vld [vmem:[#allocation8 + $0x220] sm:$0xff] }
 0x20f   :  { %v3361_v44 = vpop.f32.mrb[45].mxu0  ;;  %v2493_v21 = vpop.eup %2492  ;;  %v1683_v40 = vmul.f32 %v2491_v18, %v1619_v35  ;;  %2516 = vtanh.f32 %v1678_v4  ;;  %v1598_v18 = vmul.f32 0.5, %v3279_v42  ;;  %v346_v39 = vld [vmem:[#allocation8 + $0x1e0] sm:$0xff]  ;;  %v348_v4 = vld [vmem:[#allocation8 + $0x1f0] sm:$0xff] }
 0x210   :  { %v3365_v50 = vpop.f32.mrb[40].mxu1  ;;  %v2495_v29 = vpop.eup %2494  ;;  %v3371_v54 = vmul.f32 %v2493_v21, %v1621_v12  ;;  %3744 = vst [vmem:[#allocation22_spill] sm:$0xff] %v3375_v23  ;;  %2518 = vtanh.f32 %v1679_v3  ;;  %v1238_v21 = vadd.f32 %v3218_v47, %v343_v19  ;;  %v1250_v23 = vadd.f32 %v3242_v57, %v351_v24  ;;  %v347_v19 = vld [vmem:[#allocation8 + $0x1e8] sm:$0xff] }
 0x211   :  { %v3373_v2 = vpop.f32.mrb[41].mxu1  ;;  %v2497_v33 = vpop.eup %2496  ;;  %v3379_v35 = vmul.f32 %v2495_v29, %v3332_v46  ;;  %2520 = vtanh.f32 %v1681_v49  ;;  %v1248_v29 = vadd.f32 %v3238_v22, %v350_v59  ;;  %v1254_v49 = vadd.f32 %v3255_v30, %v354_v63  ;;  %v349_v59 = vld [vmem:[#allocation8 + $0x1f8] sm:$0xff]  ;;  %v359_v63 = vld [vmem:[#allocation8 + $0x248] sm:$0xff] }
 0x212   :  { %v3381_v6 = vpop.f32.mrb[46].mxu0  ;;  %v2499_v51 = vpop.eup %2498  ;;  %v3384_v12 = vmul.f32 %v2497_v33, %v1622_v62  ;;  %2522 = vtanh.f32 %v1680_v37  ;;  %v1447_v62 = vadd.f32 %v3250_v53, %v345_v20  ;;  %v353_v33 = vld [vmem:[#allocation8 + $0x218] sm:$0xff]  ;;  %v3405_v22 = vadd.f32 0.5, %v1596_v52  ;;  %v358_v20 = vld [vmem:[#allocation8 + $0x240] sm:$0xff] }
 0x213   :  { %3745 = vst [vmem:[#allocation23_spill] sm:$0xff] %v3381_v6  ;;  %v3387_v45 = vpop.f32.mrb[47].mxu0  ;;  %v2501_v31 = vpop.eup %2500  ;;  %v3389_v46 = vmul.f32 %v2499_v51, %v1623_v0  ;;  %v352_v6 = vld [vmem:[#allocation8 + $0x210] sm:$0xff]  ;;  %2524 = vtanh.f32 %v1682_v58  ;;  %v1242_v57 = vadd.f32 %v3227_v60, %v346_v39  ;;  %v1256_v37 = vadd.f32 %v3262_v43, %v355_v5  ;;  %v362_v5 = vld [vmem:[#allocation8 + $0x260] sm:$0xff] }
 0x214   :  { %v3393_v42 = vpop.f32.mrb[42].mxu1  ;;  %v3395_v3 = vpop.eup %2502  ;;  %v3397_v47 = vmul.f32 %v2501_v31, %v1625_v10  ;;  %v3411_v24 = vadd.f32 0.5, %v1598_v18  ;;  %2526 = vtanh.f32 %v1683_v40  ;;  %v1451_v53 = vadd.f32 %v3267_v14, %v348_v4  ;;  %v356_v43 = vld [vmem:[#allocation8 + $0x230] sm:$0xff]  ;;  %v363_v4 = vld [vmem:[#allocation8 + $0x268] sm:$0xff] }
 0x215   :  { %v3401_v0 = vpop.f32.mrb[43].mxu1  ;;  %v3403_v51 = vpop.eup %2504  ;;  %v1457_v30 = vadd.f32 %v3287_v25, %v352_v6  ;;  %2528 = vtanh.f32 %v1238_v21  ;;  %v1244_v58 = vadd.f32 %v3230_v34, %v347_v19  ;;  %v1695_v60 = vmul.f32 0.5, %v1248_v29  ;;  %v357_v6 = vld [vmem:[#allocation8 + $0x238] sm:$0xff]  ;;  %v360_v29 = vld [vmem:[#allocation8 + $0x250] sm:$0xff] }
 0x216   :  { %v3409_v10 = vpop.eup %2506  ;;  %v1459_v52 = vadd.f32 %v3292_v13, %v353_v33  ;;  %2530 = vtanh.f32 %v1447_v62  ;;  %v1453_v14 = vadd.f32 %v3272_v17, %v349_v59  ;;  %v1696_v25 = vmul.f32 0.5, %v1250_v23  ;;  %v366_v33 = vld [vmem:[#allocation8 + $0x280] sm:$0xff]  ;;  %v367_v62 = vld [vmem:[#allocation8 + $0x288] sm:$0xff] }
 0x217   :  { %v3415_v31 = vpop.eup %2508  ;;  %v3419_v39 = vpop.f32.mrb[44].mxu1  ;;  %v1699_v40 = vmul.f32 0.5, %v1254_v49  ;;  %2532 = vtanh.f32 %v1242_v57  ;;  %v3428_v34 = vmul.f32 0.5, %v1256_v37  ;;  %v1260_v13 = vadd.f32 %v3277_v8, %v358_v20  ;;  %v361_v49 = vld [vmem:[#allocation8 + $0x258] sm:$0xff] }
 0x218   :  { %3746 = vst [vmem:[#allocation24_spill] sm:$0xff] %v3415_v31  ;;  %v3421_v18 = vpop.eup %2510  ;;  %v3424_v31 = vpop.f32.mrb[45].mxu1  ;;  %v1262_v19 = vadd.f32 %v3282_v15, %v359_v63  ;;  %2534 = vtanh.f32 %v1451_v53  ;;  %v1697_v17 = vmul.f32 0.5, %v1457_v30  ;;  %v1463_v23 = vadd.f32 %v3313_v7, %v356_v43  ;;  %v371_v30 = vld [vmem:[#allocation8 + $0x2a8] sm:$0xff] }
 0x219   :  { %3747 = vst [vmem:[#allocation25_spill] sm:$0xff] %v3421_v18  ;;  %v3426_v21 = vpop.eup %2512  ;;  %v1266_v59 = vadd.f32 %v3299_v38, %v362_v5  ;;  %2536 = vtanh.f32 %v1244_v58  ;;  %v1698_v37 = vmul.f32 0.5, %v1459_v52  ;;  %v1465_v8 = vadd.f32 %v3320_v56, %v357_v6 }
 0x21a   :  { %3748 = vst [vmem:[#allocation26_spill] sm:$0xff] %v3426_v21  ;;  %v3432_v18 = vpop.eup %2514  ;;  %v370_v21 = vld [vmem:[#allocation8 + $0x2a0] sm:$0xff]  ;;  %v1268_v15 = vadd.f32 %v3306_v1, %v363_v4  ;;  %2538 = vtanh.f32 %v1453_v14  ;;  %v1469_v53 = vadd.f32 %v3334_v16, %v360_v29  ;;  %v1272_v7 = vadd.f32 %v3326_v28, %v366_v33 }
 0x21b   :  { %v3436_v57 = vpop.eup %2516  ;;  %v3440_v20 = vpop.f32.mrb[46].mxu1  ;;  %v1274_v38 = vadd.f32 %v3330_v9, %v367_v62  ;;  %2540 = vtanh.f32 %v1695_v60  ;;  %v3451_v56 = vmul.f32 0.5, %v1260_v13  ;;  %v1471_v1 = vadd.f32 %v3336_v61, %v361_v49  ;;  %v364_v9 = vld [vmem:[#allocation8 + $0x270] sm:$0xff]  ;;  %v365_v13 = vld [vmem:[#allocation8 + $0x278] sm:$0xff]  ;;  %v375_v62 = vld [vmem:[#allocation8 + $0x2c8] sm:$0xff] }
 0x21c   :  { %v3442_v63 = vpop.eup %2518  ;;  %v3447_v43 = vpop.f32.mrb[47].mxu1  ;;  %v1278_v52 = vadd.f32 %v3339_v32, %v370_v21  ;;  %2542 = vtanh.f32 %v1697_v17  ;;  %v1701_v16 = vmul.f32 0.5, %v1463_v23  ;;  %v3457_v14 = vmul.f32 0.5, %v1262_v19  ;;  %v374_v32 = vld [vmem:[#allocation8 + $0x2c0] sm:$0xff]  ;;  %v368_v49 = vld [vmem:[#allocation8 + $0x290] sm:$0xff] }
 0x21d   :  { %v3449_v58 = vpop.eup %2520  ;;  %v3459_v28 = vmul.f32 0.5, %v1266_v59  ;;  %2544 = vtanh.f32 %v1696_v25  ;;  %v3463_v4 = vmul.f32 0.5, %v1465_v8  ;;  %v3465_v60 = vmul.f32 0.5, %v1268_v15  ;;  %v369_v59 = vld [vmem:[#allocation8 + $0x298] sm:$0xff] }
 0x21e   :  { %v3455_v5 = vpop.eup %2522  ;;  %v1280_v61 = vadd.f32 %v3344_v36, %v371_v30  ;;  %2546 = vtanh.f32 %v1698_v37  ;;  %v3470_v29 = vmul.f32 0.5, %v1469_v53  ;;  %v3472_v19 = vmul.f32 0.5, %v1272_v7  ;;  %v378_v7 = vld [vmem:[#allocation8 + $0x2e0] sm:$0xff] }
 0x21f   :  { %v3461_v6 = vpop.eup %2524  ;;  %v3474_v33 = vmul.f32 0.5, %v1274_v38  ;;  %2548 = vtanh.f32 %v1699_v40  ;;  %v3476_v25 = vmul.f32 0.5, %v1471_v1  ;;  %v1475_v23 = vadd.f32 %v3349_v27, %v364_v9 }
 0x220   :  { %v3468_v21 = vpop.eup %2526  ;;  %v3479_v36 = vmul.f32 0.5, %v1278_v52  ;;  %2550 = vtanh.f32 %v1701_v16  ;;  %v1477_v15 = vadd.f32 %v3354_v11, %v365_v13  ;;  %v1284_v53 = vadd.f32 %v3358_v55, %v374_v32  ;;  %v379_v52 = vld [vmem:[#allocation8 + $0x2e8] sm:$0xff] }
 0x221   :  { %v2529_v17 = vpop.eup %2528  ;;  %2552 = vtanh.f32 %v3428_v34  ;;  %v3486_v30 = vmul.f32 0.5, %v1280_v61  ;;  %v1286_v27 = vadd.f32 %v3361_v44, %v375_v62  ;;  %v1481_v11 = vadd.f32 %v3365_v50, %v368_v49  ;;  %v3750_v44 = vld [vmem:[#allocation23_spill] sm:$0xff] }
 0x222   :  { %v2531_v8 = vpop.eup %2530  ;;  %v1688_v37 = vmul.f32 %v2529_v17, %v3363_v48  ;;  %2554 = vtanh.f32 %v3371_v54  ;;  %v1483_v55 = vadd.f32 %v3373_v2, %v369_v59  ;;  %v3499_v9 = vmul.f32 0.5, %v1475_v23  ;;  %v372_v54 = vld [vmem:[#allocation8 + $0x2b0] sm:$0xff]  ;;  %v373_v62 = vld [vmem:[#allocation8 + $0x2b8] sm:$0xff] }
 0x223   :  { %v2533_v38 = vpop.eup %2532  ;;  %v1690_v40 = vmul.f32 %v2531_v8, %v3367_v26  ;;  %2556 = vtanh.f32 %v3379_v35  ;;  %v3749_v26 = vld [vmem:[#allocation22_spill] sm:$0xff]  ;;  %v1290_v13 = vadd.f32 %v3750_v44, %v378_v7  ;;  %v3506_v50 = vmul.f32 0.5, %v1477_v15  ;;  %v3752_v44 = vld [vmem:[#allocation15_spill] sm:$0xff] }
 0x224   :  { %v2535_v1 = vpop.eup %2534  ;;  %v3491_v48 = vmul.f32 %v2533_v38, %v3369_v41  ;;  %2558 = vtanh.f32 %v3384_v12  ;;  %v3508_v2 = vmul.f32 0.5, %v1284_v53  ;;  %v3514_v17 = vmul.f32 0.5, %v1286_v27 }
 0x225   :  { %v2537_v16 = vpop.eup %2536  ;;  %v3497_v34 = vmul.f32 %v2535_v1, %v3749_v26  ;;  %2560 = vtanh.f32 %v3389_v46  ;;  %v1292_v23 = vadd.f32 %v3387_v45, %v379_v52  ;;  %v3518_v49 = vmul.f32 0.5, %v1481_v11 }
 0x226   :  { %v2539_v61 = vpop.eup %2538  ;;  %v3504_v41 = vmul.f32 %v2537_v16, %v3405_v22  ;;  %2562 = vtanh.f32 %v3397_v47  ;;  %v3520_v59 = vmul.f32 0.5, %v1483_v55  ;;  %v1487_v46 = vadd.f32 %v3393_v42, %v372_v54  ;;  %v3751_v55 = vld [vmem:[#allocation14_spill] sm:$0xff] }
 0x227   :  { %v2541_v32 = vpop.eup %2540  ;;  %v3512_v35 = vmul.f32 %v2539_v61, %v3411_v24  ;;  %2564 = vtanh.f32 %v1688_v37  ;;  %v3523_v24 = vmul.f32 0.5, %v1290_v13  ;;  %v1489_v45 = vadd.f32 %v3401_v0, %v373_v62 }
 0x228   :  { %v2543_v12 = vpop.eup %2542  ;;  %v1759_v22 = vmul.f32 0.5, %v2541_v32  ;;  %2566 = vtanh.f32 %v3463_v4  ;;  %v3528_v11 = vmul.f32 0.5, %v1292_v23  ;;  %v376_v23 = vld [vmem:[#allocation8 + $0x2d0] sm:$0xff] }
 0x229   :  { %v2545_v8 = vpop.eup %2544  ;;  %v1761_v15 = vmul.f32 0.5, %v2543_v12  ;;  %2568 = vtanh.f32 %v3451_v56  ;;  %v3753_v56 = vld [vmem:[#allocation16_spill] sm:$0xff] }
 0x22a   :  { %v2547_v53 = vpop.eup %2546  ;;  %v1791_v7 = vadd.f32 0.5, %v1759_v22  ;;  %v1760_v38 = vmul.f32 0.5, %v2545_v8  ;;  %2570 = vtanh.f32 %v3470_v29  ;;  %v377_v12 = vld [vmem:[#allocation8 + $0x2d8] sm:$0xff]  ;;  %v382_v29 = vld [vmem:[%s3730_s5] sm:$0xff] }
 0x22b   :  { %v2549_v47 = vpop.eup %2548  ;;  %v1793_v27 = vadd.f32 0.5, %v1761_v15  ;;  %v1762_v1 = vmul.f32 0.5, %v2547_v53  ;;  %2572 = vtanh.f32 %v3457_v14  ;;  %v3754_v8 = vld [vmem:[#allocation17_spill] sm:$0xff] }
 0x22c   :  { %v2551_v37 = vpop.eup %2550  ;;  %v1855_v52 = vmul.f32 %v3751_v55, %v1791_v7  ;;  %v1792_v42 = vadd.f32 0.5, %v1760_v38  ;;  %v1763_v16 = vmul.f32 0.5, %v2549_v47  ;;  %2574 = vtanh.f32 %v1690_v40  ;;  %v386_v14 = vld [vmem:[%s3730_s5 + $0x20] sm:$0xff]  ;;  %v384_v38 = vld [vmem:[%s3730_s5 + $0x10] sm:$0xff] }
 0x22d   :  { %v2553_v26 = vpop.eup %2552  ;;  %v1857_v13 = vmul.f32 %v3752_v44, %v1793_v27  ;;  %v1794_v4 = vadd.f32 0.5, %v1762_v1  ;;  %v1765_v61 = vmul.f32 0.5, %v2551_v37  ;;  %2576 = vtanh.f32 %v3476_v25  ;;  %v3755_v47 = vld [vmem:[#allocation18_spill] sm:$0xff] }
 0x22e   :  { %v3534_v0 = vpop.eup %2554  ;;  %v1856_v54 = vmul.f32 %v3753_v56, %v1792_v42  ;;  %v1795_v32 = vadd.f32 0.5, %v1763_v16  ;;  %v1764_v62 = vmul.f32 0.5, %v2553_v26  ;;  %v1717_v40 = vmul.f32 0.5, %v1487_v46  ;;  %v388_v1 = vld [vmem:[%s3730_s5 + $0x30] sm:$0xff]  ;;  %v383_v46 = vld [vmem:[%s3730_s5 + $0x8] sm:$0xff] }
 0x22f   :  { %v3537_v22 = vpop.eup %2556  ;;  %v1858_v15 = vmul.f32 %v3754_v8, %v1794_v4  ;;  %v1797_v53 = vadd.f32 0.5, %v1765_v61  ;;  %2578 = vtanh.f32 %v3459_v28  ;;  %v3557_v55 = vmul.f32 0.5, %v1489_v45  ;;  %v380_v42 = vld [vmem:[#allocation8 + $0x2f0] sm:$0xff]  ;;  %v387_v44 = vld [vmem:[%s3730_s5 + $0x28] sm:$0xff] }
 0x230   :  { %v3547_v7 = vpop.eup %2558  ;;  %v1859_v27 = vmul.f32 %v3755_v47, %v1795_v32  ;;  %v1796_v37 = vadd.f32 0.5, %v1764_v62  ;;  %v3756_v16 = vld [vmem:[#allocation19_spill] sm:$0xff]  ;;  %2580 = vtanh.f32 %v3499_v9  ;;  %v1493_v4 = vadd.f32 %v3419_v39, %v376_v23  ;;  %v3757_v32 = vld [vmem:[#allocation20_spill] sm:$0xff] }
 0x231   :  { %v3559_v25 = vpop.eup %2560  ;;  %v1861_v26 = vmul.f32 %v3756_v16, %v1797_v53  ;;  %v1495_v28 = vadd.f32 %v3424_v31, %v377_v12  ;;  %v1887_v61 = vmul.f32 %v1855_v52, %v382_v29  ;;  %2582 = vtanh.f32 %v3465_v60  ;;  %v381_v52 = vld [vmem:[#allocation8 + $0x2f8] sm:$0xff] }
 0x232   :  { %v3571_v45 = vpop.eup %2562  ;;  %v1891_v56 = vmul.f32 %v1859_v27, %v386_v14  ;;  %v1860_v62 = vmul.f32 %v3757_v32, %v1796_v37  ;;  %v1889_v53 = vmul.f32 %v1857_v13, %v384_v38  ;;  %2584 = vtanh.f32 %v3506_v50  ;;  %v385_v50 = vld [vmem:[%s3730_s5 + $0x18] sm:$0xff] }
 0x233   :  { %v3575_v8 = vpop.eup %2564  ;;  %v1893_v47 = vmul.f32 %v1861_v26, %v388_v1  ;;  %v1499_v9 = vadd.f32 %v3440_v20, %v380_v42  ;;  %v1888_v39 = vmul.f32 %v1856_v54, %v383_v46  ;;  %2586 = vtanh.f32 %v3472_v19  ;;  %v389_v42 = vld [vmem:[%s3730_s5 + $0x38] sm:$0xff] }
 0x234   :  { %v2567_v16 = vpop.eup %2566  ;;  %v1919_v23 = vadd.f32 %v1891_v56, %v1887_v61  ;;  %v1892_v31 = vmul.f32 %v1860_v62, %v387_v44  ;;  %2588 = vtanh.f32 %v3518_v49  ;;  %v3581_v60 = vmul.f32 0.5, %v1493_v4  ;;  %v392_v62 = vld [vmem:[%s3730_s5 + $0x50] sm:$0xff] }
 0x235   :  { %v2569_v12 = vpop.eup %2568  ;;  %v1945_v29 = vadd.f32 %v1893_v47, %v1889_v53  ;;  %v1766_v14 = vmul.f32 0.5, %v2567_v16  ;;  %2590 = vtanh.f32 %v3474_v33  ;;  %v3587_v54 = vmul.f32 0.5, %v1495_v28  ;;  %v3758_v28 = vld [vmem:[#allocation21_spill] sm:$0xff] }
 0x236   :  { %v2571_v13 = vpop.eup %2570  ;;  %v1932_v20 = vadd.f32 %v1892_v31, %v1888_v39  ;;  %v1767_v38 = vmul.f32 0.5, %v2569_v12  ;;  %2592 = vtanh.f32 %v3520_v59  ;;  %v3591_v49 = vadd.f32 %v3447_v43, %v381_v52  ;;  %v390_v43 = vld [vmem:[%s3730_s5 + $0x40] sm:$0xff]  ;;  %v391_v16 = vld [vmem:[%s3730_s5 + $0x48] sm:$0xff] }
 0x237   :  { %v2573_v19 = vpop.eup %2572  ;;  %v1798_v27 = vadd.f32 0.5, %v1766_v14  ;;  %v1769_v1 = vmul.f32 0.5, %v2571_v13  ;;  %2594 = vtanh.f32 %v3479_v36  ;;  %v3599_v33 = vmul.f32 0.5, %v1499_v9 }
 0x238   :  { %v3593_v37 = vpop.eup %2574  ;;  %v1799_v46 = vadd.f32 0.5, %v1767_v38  ;;  %v1768_v26 = vmul.f32 0.5, %v2573_v19  ;;  %v1890_v4 = vmul.f32 %v1858_v15, %v385_v50  ;;  %2596 = vtanh.f32 %v1717_v40 }
 0x239   :  { %v2577_v44 = vpop.eup %2576  ;;  %v1862_v61 = vmul.f32 %v3758_v28, %v1798_v27  ;;  %v1801_v59 = vadd.f32 0.5, %v1769_v1  ;;  %2598 = vtanh.f32 %v3486_v30 }
 0x23a   :  { %v2579_v56 = vpop.eup %2578  ;;  %v1863_v32 = vmul.f32 %v3395_v3, %v1799_v46  ;;  %v1800_v36 = vadd.f32 0.5, %v1768_v26  ;;  %v1770_v53 = vmul.f32 0.5, %v2577_v44  ;;  %2600 = vtanh.f32 %v3557_v55 }
 0x23b   :  { %v2581_v15 = vpop.eup %2580  ;;  %v1894_v47 = vmul.f32 %v1862_v61, %v389_v42  ;;  %v1865_v9 = vmul.f32 %v3403_v51, %v1801_v59  ;;  %v1771_v40 = vmul.f32 0.5, %v2579_v56  ;;  %v393_v51 = vld [vmem:[%s3730_s5 + $0x58] sm:$0xff]  ;;  %v396_v61 = vld [vmem:[%s3730_s5 + $0x70] sm:$0xff]  ;;  %2602 = vtanh.f32 %v3508_v2 }
 0x23c   :  { %v2583_v3 = vpop.eup %2582  ;;  %v1895_v39 = vmul.f32 %v1863_v32, %v390_v43  ;;  %v1864_v31 = vmul.f32 %v3409_v10, %v1800_v36  ;;  %v1802_v52 = vadd.f32 0.5, %v1770_v53  ;;  %v1773_v12 = vmul.f32 0.5, %v2581_v15  ;;  %v3759_v42 = vld [vmem:[#allocation24_spill] sm:$0xff]  ;;  %v395_v53 = vld [vmem:[%s3730_s5 + $0x68] sm:$0xff] }
 0x23d   :  { %v2585_v14 = vpop.eup %2584  ;;  %v1958_v13 = vadd.f32 %v1894_v47, %v1890_v4  ;;  %v1897_v30 = vmul.f32 %v1865_v9, %v392_v62  ;;  %v1803_v50 = vadd.f32 0.5, %v1771_v40  ;;  %v1772_v38 = vmul.f32 0.5, %v2583_v3  ;;  %v394_v10 = vld [vmem:[%s3730_s5 + $0x60] sm:$0xff]  ;;  %v3761_v62 = vld [vmem:[#allocation26_spill] sm:$0xff] }
 0x23e   :  { %v2587_v19 = vpop.eup %2586  ;;  %v1920_v27 = vadd.f32 %v1919_v23, %v1895_v39  ;;  %v1896_v1 = vmul.f32 %v1864_v31, %v391_v16  ;;  %v1866_v55 = vmul.f32 %v3759_v42, %v1802_v52  ;;  %v1805_v46 = vadd.f32 0.5, %v1773_v12  ;;  %v3760_v4 = vld [vmem:[#allocation25_spill] sm:$0xff]  ;;  %v400_v42 = vld [vmem:[%s3730_s5 + $0x90] sm:$0xff] }
 0x23f   :  { %v2589_v26 = vpop.eup %2588  ;;  %v1946_v44 = vadd.f32 %v1945_v29, %v1897_v30  ;;  %v1867_v28 = vmul.f32 %v3760_v4, %v1803_v50  ;;  %v1804_v43 = vadd.f32 0.5, %v1772_v38  ;;  %v1774_v59 = vmul.f32 0.5, %v2585_v14  ;;  %v399_v4 = vld [vmem:[%s3730_s5 + $0x88] sm:$0xff] }
 0x240   :  { %v2591_v56 = vpop.eup %2590  ;;  %v1933_v23 = vadd.f32 %v1932_v20, %v1896_v1  ;;  %v1898_v32 = vmul.f32 %v1866_v55, %v393_v51  ;;  %v1869_v36 = vmul.f32 %v3761_v62, %v1805_v46  ;;  %v1775_v15 = vmul.f32 0.5, %v2587_v19  ;;  %v397_v20 = vld [vmem:[%s3730_s5 + $0x78] sm:$0xff] }
 0x241   :  { %v2593_v47 = vpop.eup %2592  ;;  %v1899_v29 = vmul.f32 %v1867_v28, %v394_v10  ;;  %v1868_v9 = vmul.f32 %v3432_v18, %v1804_v43  ;;  %v1806_v16 = vadd.f32 0.5, %v1774_v59  ;;  %v1777_v40 = vmul.f32 0.5, %v2589_v26  ;;  %v398_v18 = vld [vmem:[%s3730_s5 + $0x80] sm:$0xff] }
 0x242   :  { %v2595_v3 = vpop.eup %2594  ;;  %v1959_v39 = vadd.f32 %v1958_v13, %v1898_v32  ;;  %v1901_v31 = vmul.f32 %v1869_v36, %v396_v61  ;;  %v1807_v52 = vadd.f32 0.5, %v1775_v15  ;;  %v1776_v12 = vmul.f32 0.5, %v2591_v56  ;;  %v401_v32 = vld [vmem:[%s3730_s5 + $0x98] sm:$0xff]  ;;  %v402_v15 = vld [vmem:[%s3730_s5 + $0xa0] sm:$0xff] }
 0x243   :  { %v2597_v14 = vpop.eup %2596  ;;  %v1921_v30 = vadd.f32 %v1920_v27, %v1899_v29  ;;  %v1900_v51 = vmul.f32 %v1868_v9, %v395_v53  ;;  %v1870_v50 = vmul.f32 %v3436_v57, %v1806_v16  ;;  %v1809_v38 = vadd.f32 0.5, %v1777_v40  ;;  %v404_v9 = vld [vmem:[%s3730_s5 + $0xb0] sm:$0xff] }
 0x244   :  { %v2599_v19 = vpop.eup %2598  ;;  %v1947_v1 = vadd.f32 %v1946_v44, %v1901_v31  ;;  %v1871_v13 = vmul.f32 %v3442_v63, %v1807_v52  ;;  %v1808_v55 = vadd.f32 0.5, %v1776_v12  ;;  %v1778_v10 = vmul.f32 0.5, %v2593_v47 }
 0x245   :  { %v2601_v46 = vpop.eup %2600  ;;  %v1934_v27 = vadd.f32 %v1933_v23, %v1900_v51  ;;  %v1902_v26 = vmul.f32 %v1870_v50, %v397_v20  ;;  %v1873_v57 = vmul.f32 %v3449_v58, %v1809_v38  ;;  %v1779_v28 = vmul.f32 0.5, %v2595_v3 }
 0x246   :  { %v1903_v61 = vmul.f32 %v1871_v13, %v398_v18  ;;  %v1872_v44 = vmul.f32 %v3455_v5, %v1808_v55  ;;  %v1810_v63 = vadd.f32 0.5, %v1778_v10  ;;  %v1781_v43 = vmul.f32 0.5, %v2597_v14 }
 0x247   :  { %v1960_v59 = vadd.f32 %v1959_v39, %v1902_v26  ;;  %v1905_v56 = vmul.f32 %v1873_v57, %v400_v42  ;;  %v1811_v23 = vadd.f32 0.5, %v1779_v28  ;;  %v1780_v62 = vmul.f32 0.5, %v2599_v19  ;;  %v407_v26 = vld [vmem:[%s3730_s5 + $0xc8] sm:$0xff] }
 0x248   :  { %v1922_v36 = vadd.f32 %v1921_v30, %v1903_v61  ;;  %v1904_v58 = vmul.f32 %v1872_v44, %v399_v4  ;;  %v1874_v53 = vmul.f32 %v3461_v6, %v1810_v63  ;;  %v1813_v47 = vadd.f32 0.5, %v1781_v43  ;;  %v403_v6 = vld [vmem:[%s3730_s5 + $0xa8] sm:$0xff]  ;;  %v405_v30 = vld [vmem:[%s3730_s5 + $0xb8] sm:$0xff] }
 0x249   :  { %v1948_v5 = vadd.f32 %v1947_v1, %v1905_v56  ;;  %v1875_v29 = vmul.f32 %v3468_v21, %v1811_v23  ;;  %v1812_v16 = vadd.f32 0.5, %v1780_v62  ;;  %v1782_v40 = vmul.f32 0.5, %v2601_v46 }
 0x24a   :  { %v1935_v3 = vadd.f32 %v1934_v27, %v1904_v58  ;;  %v1906_v39 = vmul.f32 %v1874_v53, %v401_v32  ;;  %v1877_v31 = vmul.f32 %v3534_v0, %v1813_v47  ;;  %2604 = vtanh.f32 %v3581_v60  ;;  %v410_v32 = vld [vmem:[%s3730_s5 + $0xe0] sm:$0xff] }
 0x24b   :  { %v1907_v20 = vmul.f32 %v1875_v29, %v402_v15  ;;  %v1876_v52 = vmul.f32 %v3537_v22, %v1812_v16  ;;  %v1814_v21 = vadd.f32 0.5, %v1782_v40  ;;  %2606 = vtanh.f32 %v3514_v17  ;;  %v2603_v17 = vpop.eup %2602  ;;  %v412_v15 = vld [vmem:[%s3730_s5 + $0xf0] sm:$0xff] }
 0x24c   :  { %v1961_v12 = vadd.f32 %v1960_v59, %v1906_v39  ;;  %v1909_v14 = vmul.f32 %v1877_v31, %v404_v9  ;;  %v1726_v0 = vmul.f32 0.5, %v3591_v49  ;;  %2608 = vtanh.f32 %v3587_v54 }
 0x24d   :  { %v1923_v51 = vadd.f32 %v1922_v36, %v1907_v20  ;;  %v1908_v50 = vmul.f32 %v1876_v52, %v403_v6  ;;  %v1878_v2 = vmul.f32 %v3547_v7, %v1814_v21  ;;  %2610 = vtanh.f32 %v3523_v24  ;;  %v413_v20 = vld [vmem:[%s3730_s5 + $0xf8] sm:$0xff] }
 0x24e   :  { %v1949_v22 = vadd.f32 %v1948_v5, %v1909_v14  ;;  %2612 = vtanh.f32 %v3599_v33  ;;  %v1783_v54 = vmul.f32 0.5, %v2603_v17 }
 0x24f   :  { %v1936_v60 = vadd.f32 %v1935_v3, %v1908_v50  ;;  %v1910_v18 = vmul.f32 %v1878_v2, %v405_v30  ;;  %2614 = vtanh.f32 %v3528_v11  ;;  %v406_v11 = vld [vmem:[%s3730_s5 + $0xc0] sm:$0xff] }
 0x250   :  { %2616 = vtanh.f32 %v1726_v0  ;;  %v1815_v1 = vadd.f32 0.5, %v1783_v54 }
 0x251   :  { %v1962_v38 = vadd.f32 %v1961_v12, %v1910_v18  ;;  %2618 = vtanh.f32 %v3491_v48 }
 0x252   :  { %2620 = vtanh.f32 %v3497_v34  ;;  %v1879_v55 = vmul.f32 %v3559_v25, %v1815_v1  ;;  %v409_v25 = vld [vmem:[%s3730_s5 + $0xd8] sm:$0xff] }
 0x253   :  { %2622 = vtanh.f32 %v3504_v41  ;;  %v408_v41 = vld [vmem:[%s3730_s5 + $0xd0] sm:$0xff] }
 0x254   :  { %v2605_v7 = vpop.eup %2604  ;;  %2624 = vtanh.f32 %v3512_v35  ;;  %v1911_v61 = vmul.f32 %v1879_v55, %v406_v11 }
 0x255   :  { %v2607_v24 = vpop.eup %2606  ;;  %v1785_v49 = vmul.f32 0.5, %v2605_v7 }
 0x256   :  { %v2609_v19 = vpop.eup %2608  ;;  %v1784_v33 = vmul.f32 0.5, %v2607_v24  ;;  %v1924_v58 = vadd.f32 %v1923_v51, %v1911_v61 }
 0x257   :  { %v2611_v13 = vpop.eup %2610  ;;  %v1817_v48 = vadd.f32 0.5, %v1785_v49  ;;  %v1786_v42 = vmul.f32 0.5, %v2609_v19 }
 0x258   :  { %v2613_v34 = vpop.eup %2612  ;;  %v1816_v35 = vadd.f32 0.5, %v1784_v33  ;;  %v1787_v10 = vmul.f32 0.5, %v2611_v13  ;;  %v2726_v13 = vmov 1966171168  }
 0x259   :  { %v2615_v46 = vpop.eup %2614  ;;  %v1881_v27 = vmul.f32 %v3571_v45, %v1817_v48  ;;  %v1818_v57 = vadd.f32 0.5, %v1786_v42  ;;  %v1789_v4 = vmul.f32 0.5, %v2613_v34  ;;  %v1983_v11 = vunpack.c.l.s4 %v2726_v13 }
 0x25a   :  { %v2617_v28 = vpop.eup %2616  ;;  %v1880_v44 = vmul.f32 %v3575_v8, %v1816_v35  ;;  %v1819_v63 = vadd.f32 0.5, %v1787_v10  ;;  %v1788_v43 = vmul.f32 0.5, %v2615_v46  ;;  %v1971_v10 = vstv %s3731_s6  ;;  %s2692_s6 = scalar_lea.vmem %s2017_s14, 64 }
 0x25b   :  { %v2619_v59 = vpop.eup %2618  ;;  %v1913_v56 = vmul.f32 %v1881_v27, %v408_v41  ;;  %v1882_v45 = vmul.f32 %v3593_v37, %v1818_v57  ;;  %v1821_v23 = vadd.f32 0.5, %v1789_v4  ;;  %v1790_v62 = vmul.f32 0.5, %v2617_v28  ;;  %v411_v37 = vld [vmem:[%s3730_s5 + $0xe8] sm:$0xff]  ;;  %p2693_p10 = scmp.ne.s32.totalorder %s2017_s14, %s2692_s6  ;;  %p2698_p12 = scmp.lt.s32.totalorder %s2692_s6, %s2692_s6 }
 0x25c   :  { %v2621_v36 = vpop.eup %2620  ;;  %v1912_v53 = vmul.f32 %v1880_v44, %v407_v26  ;;  %v1883_v8 = vmul.f32 %v2619_v59, %v1819_v63  ;;  %v1820_v47 = vadd.f32 0.5, %v1788_v43  ;;  %v1984_v26 = vunpack.c.0.s8 %v1983_v11  ;;  %v3762_v43 = vld [vmem:[#allocation13_spill] sm:$0xff] }
 0x25d   :  { %v2623_v5 = vpop.eup %2622  ;;  %v1950_v29 = vadd.f32 %v1949_v22, %v1913_v56  ;;  %v1914_v9 = vmul.f32 %v1882_v45, %v409_v25  ;;  %v1885_v16 = vmul.f32 %v2621_v36, %v1821_v23  ;;  %v1822_v40 = vadd.f32 0.5, %v1790_v62  ;;  %p2699_p13 = por %p2698_p12, %p2697_p11 }
 0x25e   :  { %v2625_v3 = vpop.eup %2624  ;;  %v1937_v39 = vadd.f32 %v1936_v60, %v1912_v53  ;;  %v1915_v31 = vmul.f32 %v1883_v8, %v410_v32  ;;  %v1884_v6 = vmul.f32 %v2623_v5, %v1820_v47  ;;  %v1987_v59 = vsub.s32 %v1984_v26, %v3762_v43 }
 0x25f   :  { %v1963_v52 = vadd.f32 %v1962_v38, %v1914_v9  ;;  %v1917_v21 = vmul.f32 %v1885_v16, %v412_v15  ;;  %v1886_v12 = vmul.f32 %v2625_v3, %v1822_v40  ;;  %p2700_p0 = pnand %p2699_p13, %p2693_p10 }
 0x260   :  { %v1925_v14 = vadd.f32 %v1924_v58, %v1915_v31  ;;  %v1916_v30 = vmul.f32 %v1884_v6, %v411_v37  ;;  %v3763_v58 = vlaneseq }
 0x261   :  { %v1951_v0 = vadd.f32 %v1950_v29, %v1917_v21  ;;  %v1918_v51 = vmul.f32 %v1886_v12, %v413_v20 }
 0x262   :  { %v1926_v50 = vrot.slane %v1925_v14, 4  ;;  %v1938_v2 = vadd.f32 %v1937_v39, %v1916_v30  ;;  %vm2007_vm1 = vcmp.lt.s32.totalorder %v3763_v58, 512 }
 0x263   :  { %v1952_v22 = vrot.slane %v1951_v0, 4  ;;  %v1964_v18 = vadd.f32 %v1963_v52, %v1918_v51 }
 0x264   :  { %v1927_v17 = vadd.f32 %v1926_v50, %v1925_v14  ;;  %v1939_v7 = vrot.slane %v1938_v2, 4 }
 0x265   :  { %v1953_v60 = vadd.f32 %v1952_v22, %v1951_v0  ;;  %v1965_v54 = vrot.slane %v1964_v18, 4 }
 0x266   :  { %v1928_v24 = vrot.slane %v1927_v17, 2  ;;  %v1940_v49 = vadd.f32 %v1939_v7, %v1938_v2 }
 0x267   :  { %v1954_v19 = vrot.slane %v1953_v60, 2  ;;  %v1966_v1 = vadd.f32 %v1965_v54, %v1964_v18 }
 0x268   :  { %v1929_v33 = vadd.f32 %v1928_v24, %v1927_v17  ;;  %v1941_v38 = vrot.slane %v1940_v49, 2 }
 0x269   :  { %v1955_v48 = vadd.f32 %v1954_v19, %v1953_v60  ;;  %v1967_v42 = vrot.slane %v1966_v1, 2 }
 0x26a   :  { %v1930_v34 = vrot.slane %v1929_v33, 1  ;;  %v1942_v55 = vadd.f32 %v1941_v38, %v1940_v49 }
 0x26b   :  { %v1956_v41 = vrot.slane %v1955_v48, 1  ;;  %v1968_v35 = vadd.f32 %v1967_v42, %v1966_v1 }
 0x26c   :  { %v1943_v46 = vrot.slane %v1942_v55, 1  ;;  %v1931_v27 = vadd.f32 %v1930_v34, %v1929_v33 }
 0x26d   :  { %v1969_v57 = vrot.slane %v1968_v35, 1  ;;  %v1957_v4 = vadd.f32 %v1956_v41, %v1955_v48 }
 0x26e   :  { %v1944_v28 = vadd.f32 %v1943_v46, %v1942_v55  ;;  %v1972_v61 = vadd.f32 %v1971_v10, %v1931_v27 }
 0x26f   :  { %v1970_v44 = vadd.f32 %v1969_v57, %v1968_v35  ;;  %v1974_v25 = vadd.f32 %v1971_v10, %v1957_v4 }
 0x270   :  { %v1973_v63 = vadd.f32 %v1971_v10, %v1944_v28 }
 0x271   :  { %v1975_v56 = vadd.f32 %v1971_v10, %v1970_v44 }
 0x272   :  { %v1980_v45 = vcombine.low %v1972_v61, %v1973_v63 }
 0x273   :  { %v1981_v32 = vcombine.low %v1974_v25, %v1975_v56 }
 0x274   :  { %v1988_v23 = vrot.slane %v1980_v45, %v1987_v59 }
 0x275   :  { %v1995_v62 = vrot.slane %v1981_v32, %v1987_v59 }
 0x277   :  { %v1996_v36 = vcombine.low %v1988_v23, %v1995_v62 }
 0x279   :  { %v2003_v53 = vrot.slane %v1996_v36, %v1987_v59 }
 0x27b   :  { %2009 = vst.msk [vmem:[#allocation9] sm:$0xf] %vm2007_vm1, %v2003_v53 }
 0x27c   :  { %2703 = shalt.err (!%p2700_p0)
}
 0x27d   :  { %s2704_s20 = scalar_lea.hbm %s3732_s7, 64 }
 0x27e   :  { %p2705_p1 = scmp.ne.s32.totalorder %s3732_s7, %s2704_s20  ;;  %p2708_p2 = scmp.lt.u32.totalorder %s2704_s20, %s3732_s7 }
 0x280   :  { %p2710_p3 = pnand %p2708_p2, %p2705_p1 }
 0x282   :  { %2713 = shalt.err (!%p2710_p3)
}
 0x283   :  { %2019 = dma.vmem_to_hbm [thread:$0]  %s2017_s14, 64, %s3732_s7, [#allocation5]  }
 0x284   :  { %2718 = dma.done.wait [#allocation5], 64  }
 0x285   :  { %2719 = vsyncadd [#allocation5], 4294967232 }
 0x286   :  { %2023 = vsyncpa [#allocation4], 1 }
 0x287   :  { %2024 = vsyncpa [#allocation7], 1 }
 0x288   :  { %2025 = vsyncpa [#allocation5], 1 }

</bundles_post_ra>
